<compile_context>
chip_gen: v6e
topology: v6e:2x2x1
jax: 0.10.0
libtpu: 0.0.40
codegen_flags: <defaults>
</compile_context>

<pallas_src>
import math

import jax
import jax.numpy as jnp
from jax import lax
from jax.experimental import pallas as pl
from jax.experimental.pallas import tpu as pltpu


def _make_kernel(num_heads: int, head_dim: int, block_b: int,
                 block_q: int, block_kv: int, e: int, d: int):
    H, hd = num_heads, head_dim
    G = block_b * H
    bf16 = jnp.bfloat16

    def kernel(q_ref, k_ref, v_ref,
               wq_ref, bq_ref, wk_ref, bk_ref, wv_ref, bv_ref,
               wo_ref, bo_ref,
               o_ref,
               qh_sc, m_sc, l_sc, acc_sc):
        kv = pl.program_id(2)

        @pl.when(kv == 0)
        def _init():
            # Q projection once per (batch, Q) tile: (bb*bq, E) x (E, D),
            # bf16 operands, f32 accumulation.  1/sqrt(hd) already folded
            # into wq/bq by the wrapper.
            q2d = q_ref[...].reshape(block_b * block_q, e)
            qp = jnp.dot(q2d, wq_ref[...],
                         preferred_element_type=jnp.float32) + bq_ref[...]
            # Head split + head-major transpose ONCE per Q tile (reused across
            # the whole KV walk).
            qh = qp.astype(bf16).reshape(block_b, block_q, H, hd)
            qh_sc[...] = qh.transpose(0, 2, 1, 3).reshape(G, block_q, hd)
            m_sc[...] = jnp.full_like(m_sc, -jnp.inf)
            l_sc[...] = jnp.zeros_like(l_sc)
            acc_sc[...] = jnp.zeros_like(acc_sc)

        # ---- per-KV-tile work -------------------------------------------
        # Project the current K/V tile (bf16 MXU operands, f32 accumulation).
        k2d = k_ref[...].reshape(block_b * block_kv, e)
        v2d = v_ref[...].reshape(block_b * block_kv, e)
        kp = jnp.dot(k2d, wk_ref[...],
                     preferred_element_type=jnp.float32) + bk_ref[...]
        vp = jnp.dot(v2d, wv_ref[...],
                     preferred_element_type=jnp.float32) + bv_ref[...]
        # Head-major relayout of the freshly projected tile (see TODO above);
        # cast to bf16 first so the relayout moves half the bytes.
        kh = kp.astype(bf16).reshape(block_b, block_kv, H, hd)
        kh = kh.transpose(0, 2, 1, 3).reshape(G, block_kv, hd)
        vh = vp.astype(bf16).reshape(block_b, block_kv, H, hd)
        vh = vh.transpose(0, 2, 1, 3).reshape(G, block_kv, hd)

        # Scores for all (batch, head) pairs in one leading-batch dot:
        # (G, bq, hd) x (G, bkv, hd) -> (G, bq, bkv), f32 accumulation.
        s = lax.dot_general(
            qh_sc[...], kh,
            dimension_numbers=(((2,), (2,)), ((0,), (0,))),
            preferred_element_type=jnp.float32)

        # Online softmax; stats are lane-dense (G, block_q), math in f32.
        m_prev = m_sc[...]
        m_new = jnp.maximum(m_prev, jnp.max(s, axis=-1))
        alpha = jnp.exp(m_prev - m_new)
        p = jnp.exp(s - m_new[:, :, None])
        l_sc[...] = alpha * l_sc[...] + jnp.sum(p, axis=-1)
        # (G, bq, bkv) x (G, bkv, hd) -> (G, bq, hd)
        pv = lax.dot_general(
            p.astype(bf16), vh,
            dimension_numbers=(((2,), (1,)), ((0,), (0,))),
            preferred_element_type=jnp.float32)
        acc_sc[...] = alpha[:, :, None] * acc_sc[...] + pv
        m_sc[...] = m_new

        @pl.when(kv == pl.num_programs(2) - 1)
        def _finalize():
            # Normalize (approx reciprocal -> EUP slot, essentially free).
            inv_l = pl.reciprocal(l_sc[...], approx=True)
            ctx = acc_sc[...] * inv_l[:, :, None]            # (G, bq, hd)
            # Recombine heads once per Q tile: (G, bq, hd) -> (bb*bq, D).
            ctx = ctx.reshape(block_b, H, block_q, hd).transpose(0, 2, 1, 3)
            ctx = ctx.reshape(block_b * block_q, d)
            out = jnp.dot(ctx.astype(bf16), wo_ref[...],
                          preferred_element_type=jnp.float32) + bo_ref[...]
            o_ref[...] = out.reshape(block_b, block_q, e).astype(o_ref.dtype)

    return kernel


def _default_vmem_limit_bytes() -> int:
    try:
        cap = int(pltpu.get_tpu_info().vmem_capacity_bytes)
    except Exception:
        cap = 64 * 1024 * 1024
    # ~100 MB on 128-MiB parts (v5e/v6e), ~57 MB on 64-MiB parts (v7x).
    return min(int(cap * 0.9), 100 * 1024 * 1024)


def sam_attention_pallas(q, k, v, params, num_heads: int, *,
                         block_b=None, block_q=None, block_kv=None,
                         vmem_limit_bytes=None):
    """Fused SAM attention forward.  q: (B, Nq, E); k, v: (B, Nk, E)."""
    B, Nq, E = q.shape
    Bk, Nk, Ek = k.shape
    assert Bk == B and Ek == E and v.shape == k.shape
    out_dtype = q.dtype
    D = params["wq"].shape[0]                 # internal_dim
    assert D % num_heads == 0
    hd = D // num_heads
    scale = 1.0 / math.sqrt(hd)

    # ---- tile selection --------------------------------------------------
    if block_q is None:
        block_q = min(Nq, 256)                # bound per-tile scratch / scores
    if block_q >= Nq:
        block_q = Nq
    else:
        assert Nq % block_q == 0 and block_q % 8 == 0, \
            "block_q must divide Nq and be a multiple of 8"

    if block_kv is None:
        block_kv = min(Nk, 512)
    if block_kv >= Nk:
        block_kv = Nk
    else:
        assert Nk % block_kv == 0, "block_kv must divide Nk (no tail masking)"
        assert block_kv % 128 == 0, \
            "block_kv must be a multiple of 128 (256+ preferred on v6e/v7x)"

    if block_b is None:
        # Fill the MXU M dim (~256 rows on v6e/v7x) for the projection matmuls.
        block_b = max(1, min(B, pl.cdiv(256, block_q)))
    block_b = max(1, min(block_b, B))
    while B % block_b:
        block_b -= 1
    # v7x has 2 TensorCores; keep >= 2 steps on the parallel axes when possible.
    if (B // block_b) * (Nq // block_q) < 2 and block_b > 1:
        block_b = max(1, block_b // 2)
        while B % block_b:
            block_b -= 1

    if vmem_limit_bytes is None:
        vmem_limit_bytes = _default_vmem_limit_bytes()

    f32, bf16 = jnp.float32, jnp.bfloat16
    # bf16 weights pre-transposed to (in, out); 1/sqrt(hd) folded into wq/bq.
    wq_t = (params["wq"].astype(f32) * scale).T.astype(bf16)   # (E, D)
    wk_t = params["wk"].astype(f32).T.astype(bf16)             # (E, D)
    wv_t = params["wv"].astype(f32).T.astype(bf16)             # (E, D)
    wo_t = params["wo"].astype(f32).T.astype(bf16)             # (D, E)
    bq = (params["bq"].astype(f32) * scale).reshape(1, D)
    bk = params["bk"].astype(f32).reshape(1, D)
    bv = params["bv"].astype(f32).reshape(1, D)
    bo = params["bo"].astype(f32).reshape(1, E)

    # bf16 activation streams: halves HBM->VMEM traffic (callers may pass bf16).
    q = q.astype(bf16)
    k = k.astype(bf16)
    v = v.astype(bf16)

    kernel = _make_kernel(num_heads, hd, block_b, block_q, block_kv, E, D)
    G = block_b * num_heads
    n_q_tiles = Nq // block_q
    grid = (B // block_b, n_q_tiles, Nk // block_kv)
    full = lambda b, qi, kv: (0, 0)

    cost = pl.CostEstimate(
        flops=int(2 * B * (Nq * E * D                       # q projection
                           + 2 * n_q_tiles * Nk * E * D     # k/v proj (per Q tile)
                           + 2 * Nq * Nk * D                # qk^T + pv
                           + Nq * D * E)),                  # out projection
        transcendentals=int(B * num_heads * Nq * Nk),
        bytes_accessed=int(2 * (q.size + n_q_tiles * (k.size + v.size))
                           + 4 * B * Nq * E
                           + 2 * (wq_t.size + wk_t.size + wv_t.size + wo_t.size)
                           + 4 * (bq.size + bk.size + bv.size + bo.size)))

    return pl.pallas_call(
        kernel,
        out_shape=jax.ShapeDtypeStruct((B, Nq, E), out_dtype),
        grid=grid,
        in_specs=[
            pl.BlockSpec((block_b, block_q, E), lambda b, qi, kv: (b, qi, 0)),
            pl.BlockSpec((block_b, block_kv, E), lambda b, qi, kv: (b, kv, 0)),
            pl.BlockSpec((block_b, block_kv, E), lambda b, qi, kv: (b, kv, 0)),
            pl.BlockSpec((E, D), full), pl.BlockSpec((1, D), full),
            pl.BlockSpec((E, D), full), pl.BlockSpec((1, D), full),
            pl.BlockSpec((E, D), full), pl.BlockSpec((1, D), full),
            pl.BlockSpec((D, E), full), pl.BlockSpec((1, E), full),
        ],
        out_specs=pl.BlockSpec((block_b, block_q, E), lambda b, qi, kv: (b, qi, 0)),
        scratch_shapes=[
            pltpu.VMEM((G, block_q, hd), bf16),   # head-major Q (persists over KV walk)
            pltpu.VMEM((G, block_q), f32),        # running max (lane-dense)
            pltpu.VMEM((G, block_q), f32),        # running softmax denom (lane-dense)
            pltpu.VMEM((G, block_q, hd), f32),    # unnormalized output accumulator
        ],
        compiler_params=pltpu.CompilerParams(
            dimension_semantics=("parallel", "parallel", "arbitrary"),
            vmem_limit_bytes=vmem_limit_bytes),
        cost_estimate=cost,
    )(q, k, v, wq_t, bq, wk_t, bk, wv_t, bv, wo_t, bo)


def sam_attention_ref(q, k, v, params, num_heads: int):
    """Pure-JAX f32 reference mirroring the PyTorch module exactly."""
    D = params["wq"].shape[0]
    hd = D // num_heads
    B, Nq, E = q.shape

    def lin(x, w, b):
        return jnp.einsum("bne,de->bnd", x, w) + b

    qp = lin(q, params["wq"], params["bq"])
    kp = lin(k, params["wk"], params["bk"])
    vp = lin(v, params["wv"], params["bv"])

    def split(x):  # (B, N, D) -> (B, H, N, hd)
        Bx, N, _ = x.shape
        return x.reshape(Bx, N, num_heads, hd).transpose(0, 2, 1, 3)

    qh, kh, vh = split(qp), split(kp), split(vp)
    attn = jnp.einsum("bhqd,bhkd->bhqk", qh, kh) / math.sqrt(hd)
    attn = jax.nn.softmax(attn, axis=-1)
    out = jnp.einsum("bhqk,bhkd->bhqd", attn, vh)
    out = out.transpose(0, 2, 1, 3).reshape(B, Nq, D)
    return jnp.einsum("bnd,ed->bne", out, params["wo"]) + params["bo"]


def init_params(key, embedding_dim: int, internal_dim: int):
    """Deterministic PyTorch-Linear-style init (uniform +-1/sqrt(fan_in))."""
    ks = jax.random.split(key, 8)

    def lin_init(kw, kb, out_f, in_f):
        bound = 1.0 / math.sqrt(in_f)
        w = jax.random.uniform(kw, (out_f, in_f), jnp.float32, -bound, bound)
        b = jax.random.uniform(kb, (out_f,), jnp.float32, -bound, bound)
        return w, b

    wq, bq = lin_init(ks[0], ks[1], internal_dim, embedding_dim)
    wk, bk = lin_init(ks[2], ks[3], internal_dim, embedding_dim)
    wv, bv = lin_init(ks[4], ks[5], internal_dim, embedding_dim)
    wo, bo = lin_init(ks[6], ks[7], embedding_dim, internal_dim)
    return dict(wq=wq, bq=bq, wk=wk, bk=bk, wv=wv, bv=bv, wo=wo, bo=bo)


if __name__ == "__main__":
    embedding_dim = 32
    num_heads = 4
    downsample_rate = 1
    internal_dim = embedding_dim // downsample_rate
    B, Nq, Nk = 2, 8, 8

    key = jax.random.PRNGKey(0)
    kq, kk, kv, kp = jax.random.split(key, 4)
    q = jax.random.normal(kq, (B, Nq, embedding_dim), jnp.float32)
    k = jax.random.normal(kk, (B, Nk, embedding_dim), jnp.float32)
    v = jax.random.normal(kv, (B, Nk, embedding_dim), jnp.float32)
    params = init_params(kp, embedding_dim, internal_dim)

    out = sam_attention_pallas(q, k, v, params, num_heads)
    out = jax.block_until_ready(out)

    ref = sam_attention_ref(q, k, v, params, num_heads)
    assert out.shape == (B, Nq, embedding_dim)
    # bf16 MXU operands / bf16 activations + approx reciprocal: compare against
    # the f32 reference with a tolerance consistent with bf16 rounding.
    assert jnp.allclose(out, ref, atol=3e-2, rtol=3e-2), "mismatch vs reference"

    print("KERNEL_OK")
</pallas_src>

<mosaic_0001>
module attributes {stable_mosaic.version = 11 : i64} {
  func.func @kernel(%arg0: i32, %arg1: i32, %arg2: i32, %arg3: memref<1x8x32xbf16, #tpu.memory_space<vmem>>, %arg4: memref<1x8x32xbf16, #tpu.memory_space<vmem>>, %arg5: memref<1x8x32xbf16, #tpu.memory_space<vmem>>, %arg6: memref<32x32xbf16, #tpu.memory_space<vmem>>, %arg7: memref<1x32xf32, #tpu.memory_space<vmem>>, %arg8: memref<32x32xbf16, #tpu.memory_space<vmem>>, %arg9: memref<1x32xf32, #tpu.memory_space<vmem>>, %arg10: memref<32x32xbf16, #tpu.memory_space<vmem>>, %arg11: memref<1x32xf32, #tpu.memory_space<vmem>>, %arg12: memref<32x32xbf16, #tpu.memory_space<vmem>>, %arg13: memref<1x32xf32, #tpu.memory_space<vmem>>, %arg14: memref<1x8x32xf32, #tpu.memory_space<vmem>>, %arg15: memref<4x8x8xbf16, #tpu.memory_space<vmem>>, %arg16: memref<4x8xf32, #tpu.memory_space<vmem>>, %arg17: memref<4x8xf32, #tpu.memory_space<vmem>>, %arg18: memref<4x8x8xf32, #tpu.memory_space<vmem>>) attributes {dimension_semantics = [#tpu.dimension_semantics<parallel>, #tpu.dimension_semantics<parallel>, #tpu.dimension_semantics<arbitrary>], iteration_bounds = array<i64: 2, 1, 1>, scalar_prefetch = 0 : i64, scratch_operands = 4 : i64, tpu.core_type = #tpu.core_type<tc>, window_params = [{transform_indices = @transform_0, window_bounds = array<i64: 1, 8, 32>}, {transform_indices = @transform_1, window_bounds = array<i64: 1, 8, 32>}, {transform_indices = @transform_2, window_bounds = array<i64: 1, 8, 32>}, {pipeline_mode = #tpu.pipeline_mode<synchronous>, transform_indices = @transform_3, window_bounds = array<i64: 32, 32>}, {pipeline_mode = #tpu.pipeline_mode<synchronous>, transform_indices = @transform_4, window_bounds = array<i64: 1, 32>}, {pipeline_mode = #tpu.pipeline_mode<synchronous>, transform_indices = @transform_5, window_bounds = array<i64: 32, 32>}, {pipeline_mode = #tpu.pipeline_mode<synchronous>, transform_indices = @transform_6, window_bounds = array<i64: 1, 32>}, {pipeline_mode = #tpu.pipeline_mode<synchronous>, transform_indices = @transform_7, window_bounds = array<i64: 32, 32>}, {pipeline_mode = #tpu.pipeline_mode<synchronous>, transform_indices = @transform_8, window_bounds = array<i64: 1, 32>}, {pipeline_mode = #tpu.pipeline_mode<synchronous>, transform_indices = @transform_9, window_bounds = array<i64: 32, 32>}, {pipeline_mode = #tpu.pipeline_mode<synchronous>, transform_indices = @transform_10, window_bounds = array<i64: 1, 32>}, {transform_indices = @transform_11, window_bounds = array<i64: 1, 8, 32>}]} {
    %c0_i32 = arith.constant 0 : i32
    %0 = arith.cmpi eq, %arg2, %c0_i32 : i32
    %1 = arith.extui %0 : i1 to i32
    %c0_i32_0 = arith.constant 0 : i32
    %2 = arith.cmpi ne, %1, %c0_i32_0 : i32
    scf.if %2 {
      %c0_38 = arith.constant 0 : index
      %c0_39 = arith.constant 0 : index
      %c0_40 = arith.constant 0 : index
      %53 = vector.load %arg3[%c0_38, %c0_39, %c0_40] : memref<1x8x32xbf16, #tpu.memory_space<vmem>>, vector<1x8x32xbf16>
      %54 = vector.shape_cast %53 : vector<1x8x32xbf16> to vector<8x32xbf16>
      %c0_41 = arith.constant 0 : index
      %c0_42 = arith.constant 0 : index
      %55 = vector.load %arg6[%c0_41, %c0_42] : memref<32x32xbf16, #tpu.memory_space<vmem>>, vector<32x32xbf16>
      %cst_43 = arith.constant dense<0.000000e+00> : vector<8x32xf32>
      %56 = tpu.matmul %54, %55, %cst_43 {dimension_numbers = #tpu.dot_dimension_numbers<[1], [0], [0], [1], [0, 0, 1, 1], [], []>} : vector<8x32xbf16>, vector<32x32xbf16>, vector<8x32xf32> -> vector<8x32xf32>
      %c0_44 = arith.constant 0 : index
      %c0_45 = arith.constant 0 : index
      %57 = vector.load %arg7[%c0_44, %c0_45] : memref<1x32xf32, #tpu.memory_space<vmem>>, vector<1x32xf32>
      %58 = vector.broadcast %57 : vector<1x32xf32> to vector<8x32xf32>
      %59 = arith.addf %56, %58 : vector<8x32xf32>
      %60 = arith.truncf %59 : vector<8x32xf32> to vector<8x32xbf16>
      %61 = vector.shape_cast %60 : vector<8x32xbf16> to vector<1x8x4x8xbf16>
      %62 = tpu.transpose %61, [0, 2, 1, 3] : vector<1x8x4x8xbf16> -> vector<1x4x8x8xbf16>
      %63 = vector.shape_cast %62 : vector<1x4x8x8xbf16> to vector<4x8x8xbf16>
      %c0_46 = arith.constant 0 : index
      %c0_47 = arith.constant 0 : index
      %c0_48 = arith.constant 0 : index
      %64 = vector.load %arg15[%c0_46, %c0_47, %c0_48] : memref<4x8x8xbf16, #tpu.memory_space<vmem>>, vector<4x8x8xbf16>
      tpu.vector_store %arg15[%c0_46, %c0_47, %c0_48], %63 {strides = array<i32>} : memref<4x8x8xbf16, #tpu.memory_space<vmem>>, vector<4x8x8xbf16>,
      %cst_49 = arith.constant 0xFF800000 : f32
      %65 = vector.broadcast %cst_49 : f32 to vector<4x8xf32>
      %c0_50 = arith.constant 0 : index
      %c0_51 = arith.constant 0 : index
      %66 = vector.load %arg16[%c0_50, %c0_51] : memref<4x8xf32, #tpu.memory_space<vmem>>, vector<4x8xf32>
      tpu.vector_store %arg16[%c0_50, %c0_51], %65 {strides = array<i32>} : memref<4x8xf32, #tpu.memory_space<vmem>>, vector<4x8xf32>,
      %cst_52 = arith.constant 0.000000e+00 : f32
      %67 = vector.broadcast %cst_52 : f32 to vector<4x8xf32>
      %c0_53 = arith.constant 0 : index
      %c0_54 = arith.constant 0 : index
      %68 = vector.load %arg17[%c0_53, %c0_54] : memref<4x8xf32, #tpu.memory_space<vmem>>, vector<4x8xf32>
      tpu.vector_store %arg17[%c0_53, %c0_54], %67 {strides = array<i32>} : memref<4x8xf32, #tpu.memory_space<vmem>>, vector<4x8xf32>,
      %cst_55 = arith.constant 0.000000e+00 : f32
      %69 = vector.broadcast %cst_55 : f32 to vector<4x8x8xf32>
      %c0_56 = arith.constant 0 : index
      %c0_57 = arith.constant 0 : index
      %c0_58 = arith.constant 0 : index
      %70 = vector.load %arg18[%c0_56, %c0_57, %c0_58] : memref<4x8x8xf32, #tpu.memory_space<vmem>>, vector<4x8x8xf32>
      tpu.vector_store %arg18[%c0_56, %c0_57, %c0_58], %69 {strides = array<i32>} : memref<4x8x8xf32, #tpu.memory_space<vmem>>, vector<4x8x8xf32>,
    } else {
    }
    %c0 = arith.constant 0 : index
    %c0_1 = arith.constant 0 : index
    %c0_2 = arith.constant 0 : index
    %3 = vector.load %arg4[%c0, %c0_1, %c0_2] : memref<1x8x32xbf16, #tpu.memory_space<vmem>>, vector<1x8x32xbf16>
    %4 = vector.shape_cast %3 : vector<1x8x32xbf16> to vector<8x32xbf16>
    %c0_3 = arith.constant 0 : index
    %c0_4 = arith.constant 0 : index
    %c0_5 = arith.constant 0 : index
    %5 = vector.load %arg5[%c0_3, %c0_4, %c0_5] : memref<1x8x32xbf16, #tpu.memory_space<vmem>>, vector<1x8x32xbf16>
    %6 = vector.shape_cast %5 : vector<1x8x32xbf16> to vector<8x32xbf16>
    %c0_6 = arith.constant 0 : index
    %c0_7 = arith.constant 0 : index
    %7 = vector.load %arg8[%c0_6, %c0_7] : memref<32x32xbf16, #tpu.memory_space<vmem>>, vector<32x32xbf16>
    %cst = arith.constant dense<0.000000e+00> : vector<8x32xf32>
    %8 = tpu.matmul %4, %7, %cst {dimension_numbers = #tpu.dot_dimension_numbers<[1], [0], [0], [1], [0, 0, 1, 1], [], []>} : vector<8x32xbf16>, vector<32x32xbf16>, vector<8x32xf32> -> vector<8x32xf32>
    %c0_8 = arith.constant 0 : index
    %c0_9 = arith.constant 0 : index
    %9 = vector.load %arg9[%c0_8, %c0_9] : memref<1x32xf32, #tpu.memory_space<vmem>>, vector<1x32xf32>
    %10 = vector.broadcast %9 : vector<1x32xf32> to vector<8x32xf32>
    %11 = arith.addf %8, %10 : vector<8x32xf32>
    %c0_10 = arith.constant 0 : index
    %c0_11 = arith.constant 0 : index
    %12 = vector.load %arg10[%c0_10, %c0_11] : memref<32x32xbf16, #tpu.memory_space<vmem>>, vector<32x32xbf16>
    %cst_12 = arith.constant dense<0.000000e+00> : vector<8x32xf32>
    %13 = tpu.matmul %6, %12, %cst_12 {dimension_numbers = #tpu.dot_dimension_numbers<[1], [0], [0], [1], [0, 0, 1, 1], [], []>} : vector<8x32xbf16>, vector<32x32xbf16>, vector<8x32xf32> -> vector<8x32xf32>
    %c0_13 = arith.constant 0 : index
    %c0_14 = arith.constant 0 : index
    %14 = vector.load %arg11[%c0_13, %c0_14] : memref<1x32xf32, #tpu.memory_space<vmem>>, vector<1x32xf32>
    %15 = vector.broadcast %14 : vector<1x32xf32> to vector<8x32xf32>
    %16 = arith.addf %13, %15 : vector<8x32xf32>
    %17 = arith.truncf %11 : vector<8x32xf32> to vector<8x32xbf16>
    %18 = vector.shape_cast %17 : vector<8x32xbf16> to vector<1x8x4x8xbf16>
    %19 = tpu.transpose %18, [0, 2, 1, 3] : vector<1x8x4x8xbf16> -> vector<1x4x8x8xbf16>
    %20 = vector.shape_cast %19 : vector<1x4x8x8xbf16> to vector<4x8x8xbf16>
    %21 = arith.truncf %16 : vector<8x32xf32> to vector<8x32xbf16>
    %22 = vector.shape_cast %21 : vector<8x32xbf16> to vector<1x8x4x8xbf16>
    %23 = tpu.transpose %22, [0, 2, 1, 3] : vector<1x8x4x8xbf16> -> vector<1x4x8x8xbf16>
    %24 = vector.shape_cast %23 : vector<1x4x8x8xbf16> to vector<4x8x8xbf16>
    %c0_15 = arith.constant 0 : index
    %c0_16 = arith.constant 0 : index
    %c0_17 = arith.constant 0 : index
    %25 = vector.load %arg15[%c0_15, %c0_16, %c0_17] : memref<4x8x8xbf16, #tpu.memory_space<vmem>>, vector<4x8x8xbf16>
    %cst_18 = arith.constant dense<0.000000e+00> : vector<4x8x8xf32>
    %26 = tpu.matmul %25, %20, %cst_18 {dimension_numbers = #tpu.dot_dimension_numbers<[2], [2], [1], [1], [0, 0, 0, 1, 1, 1], [0], [0]>} : vector<4x8x8xbf16>, vector<4x8x8xbf16>, vector<4x8x8xf32> -> vector<4x8x8xf32>
    %c0_19 = arith.constant 0 : index
    %c0_20 = arith.constant 0 : index
    %27 = vector.load %arg16[%c0_19, %c0_20] : memref<4x8xf32, #tpu.memory_space<vmem>>, vector<4x8xf32>
    %cst_21 = arith.constant dense<0xFF800000> : vector<4x8xf32>
    %28 = vector.multi_reduction <maximumf>, %26, %cst_21 [2] : vector<4x8x8xf32> to vector<4x8xf32>
    %29 = arith.maximumf %27, %28 : vector<4x8xf32>
    %30 = arith.subf %27, %29 : vector<4x8xf32>
    %31 = math.exp %30 : vector<4x8xf32>
    %32 = vector.shape_cast %29 : vector<4x8xf32> to vector<4x8x1xf32>
    %33 = vector.broadcast %32 : vector<4x8x1xf32> to vector<4x8x8xf32>
    %34 = arith.subf %26, %33 : vector<4x8x8xf32>
    %35 = math.exp %34 : vector<4x8x8xf32>
    %c0_22 = arith.constant 0 : index
    %c0_23 = arith.constant 0 : index
    %36 = vector.load %arg17[%c0_22, %c0_23] : memref<4x8xf32, #tpu.memory_space<vmem>>, vector<4x8xf32>
    %37 = arith.mulf %31, %36 : vector<4x8xf32>
    %cst_24 = arith.constant dense<0.000000e+00> : vector<4x8xf32>
    %38 = vector.multi_reduction <add>, %35, %cst_24 [2] : vector<4x8x8xf32> to vector<4x8xf32>
    %39 = arith.addf %37, %38 : vector<4x8xf32>
    %c0_25 = arith.constant 0 : index
    %c0_26 = arith.constant 0 : index
    %40 = vector.load %arg17[%c0_25, %c0_26] : memref<4x8xf32, #tpu.memory_space<vmem>>, vector<4x8xf32>
    tpu.vector_store %arg17[%c0_25, %c0_26], %39 {strides = array<i32>} : memref<4x8xf32, #tpu.memory_space<vmem>>, vector<4x8xf32>,
    %41 = arith.truncf %35 : vector<4x8x8xf32> to vector<4x8x8xbf16>
    %cst_27 = arith.constant dense<0.000000e+00> : vector<4x8x8xf32>
    %42 = tpu.matmul %41, %24, %cst_27 {dimension_numbers = #tpu.dot_dimension_numbers<[2], [1], [1], [2], [0, 0, 0, 1, 1, 2], [0], [0]>} : vector<4x8x8xbf16>, vector<4x8x8xbf16>, vector<4x8x8xf32> -> vector<4x8x8xf32>
    %43 = vector.shape_cast %31 : vector<4x8xf32> to vector<4x8x1xf32>
    %c0_28 = arith.constant 0 : index
    %c0_29 = arith.constant 0 : index
    %c0_30 = arith.constant 0 : index
    %44 = vector.load %arg18[%c0_28, %c0_29, %c0_30] : memref<4x8x8xf32, #tpu.memory_space<vmem>>, vector<4x8x8xf32>
    %45 = vector.broadcast %43 : vector<4x8x1xf32> to vector<4x8x8xf32>
    %46 = arith.mulf %45, %44 : vector<4x8x8xf32>
    %47 = arith.addf %46, %42 : vector<4x8x8xf32>
    %c0_31 = arith.constant 0 : index
    %c0_32 = arith.constant 0 : index
    %c0_33 = arith.constant 0 : index
    %48 = vector.load %arg18[%c0_31, %c0_32, %c0_33] : memref<4x8x8xf32, #tpu.memory_space<vmem>>, vector<4x8x8xf32>
    tpu.vector_store %arg18[%c0_31, %c0_32, %c0_33], %47 {strides = array<i32>} : memref<4x8x8xf32, #tpu.memory_space<vmem>>, vector<4x8x8xf32>,
    %c0_34 = arith.constant 0 : index
    %c0_35 = arith.constant 0 : index
    %49 = vector.load %arg16[%c0_34, %c0_35] : memref<4x8xf32, #tpu.memory_space<vmem>>, vector<4x8xf32>
    tpu.vector_store %arg16[%c0_34, %c0_35], %29 {strides = array<i32>} : memref<4x8xf32, #tpu.memory_space<vmem>>, vector<4x8xf32>,
    %c0_i32_36 = arith.constant 0 : i32
    %50 = arith.cmpi eq, %arg2, %c0_i32_36 : i32
    %51 = arith.extui %50 : i1 to i32
    %c0_i32_37 = arith.constant 0 : i32
    %52 = arith.cmpi ne, %51, %c0_i32_37 : i32
    scf.if %52 {
      %c0_38 = arith.constant 0 : index
      %c0_39 = arith.constant 0 : index
      %53 = vector.load %arg17[%c0_38, %c0_39] : memref<4x8xf32, #tpu.memory_space<vmem>>, vector<4x8xf32>
      %54 = tpu.reciprocal %53 {approx = true} : vector<4x8xf32> -> vector<4x8xf32>
      %c0_40 = arith.constant 0 : index
      %c0_41 = arith.constant 0 : index
      %c0_42 = arith.constant 0 : index
      %55 = vector.load %arg18[%c0_40, %c0_41, %c0_42] : memref<4x8x8xf32, #tpu.memory_space<vmem>>, vector<4x8x8xf32>
      %56 = vector.shape_cast %54 : vector<4x8xf32> to vector<4x8x1xf32>
      %57 = vector.broadcast %56 : vector<4x8x1xf32> to vector<4x8x8xf32>
      %58 = arith.mulf %55, %57 : vector<4x8x8xf32>
      %59 = vector.shape_cast %58 : vector<4x8x8xf32> to vector<1x4x8x8xf32>
      %60 = tpu.transpose %59, [0, 2, 1, 3] : vector<1x4x8x8xf32> -> vector<1x8x4x8xf32>
      %61 = vector.shape_cast %60 : vector<1x8x4x8xf32> to vector<8x32xf32>
      %62 = arith.truncf %61 : vector<8x32xf32> to vector<8x32xbf16>
      %c0_43 = arith.constant 0 : index
      %c0_44 = arith.constant 0 : index
      %63 = vector.load %arg12[%c0_43, %c0_44] : memref<32x32xbf16, #tpu.memory_space<vmem>>, vector<32x32xbf16>
      %cst_45 = arith.constant dense<0.000000e+00> : vector<8x32xf32>
      %64 = tpu.matmul %62, %63, %cst_45 {dimension_numbers = #tpu.dot_dimension_numbers<[1], [0], [0], [1], [0, 0, 1, 1], [], []>} : vector<8x32xbf16>, vector<32x32xbf16>, vector<8x32xf32> -> vector<8x32xf32>
      %c0_46 = arith.constant 0 : index
      %c0_47 = arith.constant 0 : index
      %65 = vector.load %arg13[%c0_46, %c0_47] : memref<1x32xf32, #tpu.memory_space<vmem>>, vector<1x32xf32>
      %66 = vector.broadcast %65 : vector<1x32xf32> to vector<8x32xf32>
      %67 = arith.addf %64, %66 : vector<8x32xf32>
      %68 = vector.shape_cast %67 : vector<8x32xf32> to vector<1x8x32xf32>
      %c0_48 = arith.constant 0 : index
      %c0_49 = arith.constant 0 : index
      %c0_50 = arith.constant 0 : index
      %69 = vector.load %arg14[%c0_48, %c0_49, %c0_50] : memref<1x8x32xf32, #tpu.memory_space<vmem>>, vector<1x8x32xf32>
      tpu.vector_store %arg14[%c0_48, %c0_49, %c0_50], %68 {strides = array<i32>} : memref<1x8x32xf32, #tpu.memory_space<vmem>>, vector<1x8x32xf32>,
    } else {
    }
    return
  }
  func.func @transform_0(%arg0: i32, %arg1: i32, %arg2: i32) -> (i32, i32, i32) {
    %c0_i32 = arith.constant 0 : i32
    %c0_i32_0 = arith.constant 0 : i32
    return %arg0, %arg1, %c0_i32 : i32, i32, i32
  }
  func.func @transform_1(%arg0: i32, %arg1: i32, %arg2: i32) -> (i32, i32, i32) {
    %c0_i32 = arith.constant 0 : i32
    %c0_i32_0 = arith.constant 0 : i32
    return %arg0, %arg2, %c0_i32 : i32, i32, i32
  }
  func.func @transform_2(%arg0: i32, %arg1: i32, %arg2: i32) -> (i32, i32, i32) {
    %c0_i32 = arith.constant 0 : i32
    %c0_i32_0 = arith.constant 0 : i32
    return %arg0, %arg2, %c0_i32 : i32, i32, i32
  }
  func.func @transform_3(%arg0: i32, %arg1: i32, %arg2: i32) -> (i32, i32) {
    %c0_i32 = arith.constant 0 : i32
    %c0_i32_0 = arith.constant 0 : i32
    %c0_i32_1 = arith.constant 0 : i32
    return %c0_i32, %c0_i32_0 : i32, i32
  }
  func.func @transform_4(%arg0: i32, %arg1: i32, %arg2: i32) -> (i32, i32) {
    %c0_i32 = arith.constant 0 : i32
    %c0_i32_0 = arith.constant 0 : i32
    %c0_i32_1 = arith.constant 0 : i32
    return %c0_i32, %c0_i32_0 : i32, i32
  }
  func.func @transform_5(%arg0: i32, %arg1: i32, %arg2: i32) -> (i32, i32) {
    %c0_i32 = arith.constant 0 : i32
    %c0_i32_0 = arith.constant 0 : i32
    %c0_i32_1 = arith.constant 0 : i32
    return %c0_i32, %c0_i32_0 : i32, i32
  }
  func.func @transform_6(%arg0: i32, %arg1: i32, %arg2: i32) -> (i32, i32) {
    %c0_i32 = arith.constant 0 : i32
    %c0_i32_0 = arith.constant 0 : i32
    %c0_i32_1 = arith.constant 0 : i32
    return %c0_i32, %c0_i32_0 : i32, i32
  }
  func.func @transform_7(%arg0: i32, %arg1: i32, %arg2: i32) -> (i32, i32) {
    %c0_i32 = arith.constant 0 : i32
    %c0_i32_0 = arith.constant 0 : i32
    %c0_i32_1 = arith.constant 0 : i32
    return %c0_i32, %c0_i32_0 : i32, i32
  }
  func.func @transform_8(%arg0: i32, %arg1: i32, %arg2: i32) -> (i32, i32) {
    %c0_i32 = arith.constant 0 : i32
    %c0_i32_0 = arith.constant 0 : i32
    %c0_i32_1 = arith.constant 0 : i32
    return %c0_i32, %c0_i32_0 : i32, i32
  }
  func.func @transform_9(%arg0: i32, %arg1: i32, %arg2: i32) -> (i32, i32) {
    %c0_i32 = arith.constant 0 : i32
    %c0_i32_0 = arith.constant 0 : i32
    %c0_i32_1 = arith.constant 0 : i32
    return %c0_i32, %c0_i32_0 : i32, i32
  }
  func.func @transform_10(%arg0: i32, %arg1: i32, %arg2: i32) -> (i32, i32) {
    %c0_i32 = arith.constant 0 : i32
    %c0_i32_0 = arith.constant 0 : i32
    %c0_i32_1 = arith.constant 0 : i32
    return %c0_i32, %c0_i32_0 : i32, i32
  }
  func.func @transform_11(%arg0: i32, %arg1: i32, %arg2: i32) -> (i32, i32, i32) {
    %c0_i32 = arith.constant 0 : i32
    %c0_i32_0 = arith.constant 0 : i32
    return %arg0, %arg1, %c0_i32 : i32, i32, i32
  }
}

</mosaic_0001>

<bundles_post_ra>
// kernel: tpu_custom_call.1
= control target key start
LH: loop header
LB: loop body
LE: loop exit
PB: predicated region body
PF: predicated region fallthrough
CT: control target
= control target key end

     0   :  { %s3626_s0 = inlined_call_operand.hbm [shape: bf16[2,8,32], index: 0, kind: input, shape index: {}]   ;;  %s3627_s1 = inlined_call_operand.hbm [shape: bf16[2,8,32], index: 1, kind: input, shape index: {}]   ;;  %s3628_s2 = inlined_call_operand.hbm [shape: bf16[2,8,32], index: 2, kind: input, shape index: {}]   ;;  %s3629_s3 = inlined_call_operand.hbm [shape: bf16[32,32], index: 3, kind: input, shape index: {}]   ;;  %s3630_s4 = inlined_call_operand.hbm [shape: f32[1,32], index: 4, kind: input, shape index: {}]   ;;  %s3631_s5 = inlined_call_operand.hbm [shape: bf16[32,32], index: 5, kind: input, shape index: {}]   ;;  %s3632_s6 = inlined_call_operand.hbm [shape: f32[1,32], index: 6, kind: input, shape index: {}]   ;;  %s3633_s7 = inlined_call_operand.hbm [shape: bf16[32,32], index: 7, kind: input, shape index: {}]   ;;  %s3634_s8 = inlined_call_operand.hbm [shape: f32[1,32], index: 8, kind: input, shape index: {}]   ;;  %s3635_s9 = inlined_call_operand.vmem [shape: bf16[32,32], index: 9, kind: input, shape index: {}]   ;;  %s3636_s10 = inlined_call_operand.vmem [shape: f32[1,32], index: 10, kind: input, shape index: {}]   ;;  %s3637_s11 = inlined_call_operand.hbm [shape: f32[2,8,32], index: 11, kind: output, shape index: {}]  }
   0x1   :  { %3653 = sst [smem:[#allocation34_spill]] %s3629_s3 }
   0x2   :  { %3654 = sst [smem:[#allocation35_spill]] %s3631_s5 }
   0x3   :  { %3655 = sst [smem:[#allocation36_spill]] %s3633_s7 }
   0x4   :  { %3656 = sst [smem:[#allocation37_spill]] %s3636_s10 }
   0x5   :  { %3657 = sst [smem:[#allocation38_spill]] %s3637_s11 }
   0x6   :  { %16 = vsyncpa [#allocation7], 0 }
   0x7   :  { %18 = vsyncpa [#allocation7 + $0x1], 0 }
   0x8   :  { %19 = vsyncpa [#allocation10], 0 }
   0x9   :  { %21 = vsyncpa [#allocation10 + $0x1], 0 }
   0xa   :  { %22 = vsyncpa [#allocation13], 0 }
   0xb   :  { %23 = vsyncpa [#allocation16], 0 }
   0xc   :  { %24 = vsyncpa [#allocation19], 0 }
   0xd   :  { %25 = vsyncpa [#allocation8], 0 }
   0xe   :  { %27 = vsyncpa [#allocation8 + $0x1], 0  ;;  %s3081_s17 = smov 0   ;;  %s3083_s18 = smov 0  }
   0xf   :  { %s3085_s19 = smov 0   ;;  %s3087_s20 = smov 0  }
  0x10   :  { %s3089_s21 = smov 0   ;;  %s3091_s22 = smov 0  }
  0x11 LB: > { %3658 = sst [smem:[#allocation28_spill]] %s2975_s17  ;;  %s3112_s23 = sadd.s32 4294967295, %s2995_s22   ;;  %s2995_s22 = sphi %s3091_s22, %s33_s22   ;;  %s2991_s21 = sphi %s3089_s21, %s3698_s21   ;;  %s2987_s20 = sphi %s3087_s20, %s3697_s20   ;;  %s2983_s19 = sphi %s3085_s19, %s3701_s19   ;;  %s2979_s18 = sphi %s3083_s18, %s3700_s18   ;;  %s2975_s17 = sphi %s3081_s17, %s3699_s17  }
  0x12   : > { %3659 = sst [smem:[#allocation29_spill]] %s2991_s21  ;;  %p2329_p0 = scmp.ge.s32.totalorder %s2995_s22, 1 }
  0x13   : > { %3660 = sst [smem:[#allocation30_spill]] %s2995_s22  ;;  %p3638_p1 = scmp.eq.s32.totalorder %s3112_s23, 0 }
  0x14   : > { %p337_p2 = scmp.lt.s32.totalorder %s2995_s22, 3  ;;  %s2997_s25 = smov [#allocation12]  }
  0x15   : > { %s349_s26 = sshll.u32 %s2997_s25, 4  ;;  %s2998_s28 = smov [#allocation15]   ;;  %s350_s26 = int_to_ptr.vmem [resolvable:$true] %s349_s26 }
  0x16   : > { %p3117_p3 = pnand %p2329_p0, %p337_p2  ;;  %s373_s29 = sshll.u32 %s2998_s28, 4  ;;  %s374_s29 = int_to_ptr.vmem [resolvable:$true] %s373_s29 }
  0x17   : > { %s2999_s30 = smov [#allocation18]   ;;  %s2670_s14 = scalar_lea.vmem %s350_s26, 256 }
  0x18   : > { %s3661_s24 = scalar_select %p3117_p3, 1, 0 }
  0x19   : > { %p2524_p4 = pneg %p3117_p3  ;;  %s397_s12 = sshll.u32 %s2999_s30, 4  ;;  %s398_s12 = int_to_ptr.vmem [resolvable:$true] %s397_s12 }
  0x1a   : > { %p2671_p8 = scmp.ne.s32.totalorder %s350_s26, %s2670_s14  ;;  %p2678_p11 = scmp.lt.s32.totalorder %s350_s26, %s350_s26 }
  0x1b   : > { %p3126_p6 = pnand %p2524_p4, %p3638_p1  ;;  %p2679_p12 = scmp.lt.s32.totalorder %s2670_s14, %s2670_s14 }
  0x1d   : > { %s3662_s27 = scalar_select %p3126_p6, 1, 0 }
  0x1e   : > { %p3132_p7 = pneg %p3126_p6  ;;  %p2680_p13 = por %p2679_p12, %p2678_p11 }
  0x20   : > { %p2673_p9 = pnand %p2671_p8, %p3132_p7 }
  0x22   : > { %p2674_p10 = pneg %p2673_p9 }
  0x24   : > { %p2681_p0 = pnand %p2680_p13, %p2674_p10 }
  0x26   : > { %2684 = shalt.err (!%p2681_p0)
}
  0x27   : > { %s3000_s15 = smov 64   ;;  %s3001_s16 = smov 4  }
  0x28   : > { %s3664_s3 = sld [smem:[#allocation34_spill]]  ;;  %s2696_s30 = scalar_lea.vmem %s374_s29, 256 }
  0x29   : > { %p2697_p2 = scmp.ne.s32.totalorder %s374_s29, %s2696_s30  ;;  %p2704_p9 = scmp.lt.s32.totalorder %s374_s29, %s374_s29 }
  0x2a   : > { %p2705_p5 = scmp.lt.s32.totalorder %s2696_s30, %s2696_s30 }
  0x2b   : > { %p2699_p4 = pnand %p2697_p2, %p3132_p7 }
  0x2c   : > { %p2706_p1 = por %p2705_p5, %p2704_p9 }
  0x2d   : > { %p2700_p8 = pneg %p2699_p4 }
  0x2e   : > { %2527 = dma.hbm_to_vmem [thread:$0]  (!%p3126_p6), %s3664_s3, 256, %s350_s26, [#allocation13], %s3000_s15, %s3000_s15, %s3001_s16  }
  0x2f   : > { %p2707_p11 = pnand %p2706_p1, %p2700_p8 }
  0x31   : > { %2710 = shalt.err (!%p2707_p11)
}
  0x32   : > { %s3665_s5 = sld [smem:[#allocation35_spill]]  ;;  %s2722_s25 = scalar_lea.vmem %s398_s12, 256 }
  0x33   : > { %p2723_p10 = scmp.ne.s32.totalorder %s398_s12, %s2722_s25  ;;  %p2730_p0 = scmp.lt.s32.totalorder %s398_s12, %s398_s12 }
  0x34   : > { %p2731_p2 = scmp.lt.s32.totalorder %s2722_s25, %s2722_s25 }
  0x35   : > { %p2725_p12 = pnand %p2723_p10, %p3132_p7 }
  0x36   : > { %p2732_p4 = por %p2731_p2, %p2730_p0 }
  0x37   : > { %p2726_p13 = pneg %p2725_p12 }
  0x38   : > { %2533 = dma.hbm_to_vmem [thread:$0]  (!%p3126_p6), %s3665_s5, 256, %s374_s29, [#allocation16], %s3000_s15, %s3000_s15, %s3001_s16  }
  0x39   : > { %p2733_p3 = pnand %p2732_p4, %p2726_p13 }
  0x3b   : > { %2736 = shalt.err (!%p2733_p3)
}
  0x3c   : > { %s3666_s7 = sld [smem:[#allocation36_spill]]  ;;  %s2328_s11 = sadd.s32 4294967294, %s2995_s22  }
  0x3d   : > { %s52_s29 = sadd.s32 1, %s2991_s21  ;;  %s61_s30 = sadd.s32 1, %s2983_s19 }
  0x3e   : > { %p54_p1 = scmp.ge.s32.totalorder %s52_s29, 2  ;;  %p68_p3 = scmp.ne.s32.totalorder %s2983_s19, %s2979_s18 }
  0x3f   : > { %p69_p5 = scmp.eq.s32.totalorder %s2995_s22, 0  ;;  %p74_p8 = scmp.ne.s32.totalorder %s2979_s18, %s2975_s17 }
  0x40   : > { %s3703_s29 = smov (%p54_p1, %s52_s29), 0  ;;  %p3669_p11 = scmp.eq.s32.totalorder %s3112_s23, 0 }
  0x41   : > { %3667 = sst [smem:[#allocation31_spill]] %s3703_s29  ;;  %p3167_p9 = por %p69_p5, %p68_p3 }
  0x42   : > { %2539 = dma.hbm_to_vmem [thread:$0]  (!%p3126_p6), %s3666_s7, 256, %s398_s12, [#allocation19], %s3000_s15, %s3000_s15, %s3001_s16  }
  0x43   : > { %p3173_p10 = por %p3669_p11, %p74_p8  ;;  %s56_s15 = ssub.s32 %s2991_s21, %s3703_s29 }
  0x44   : > { %p324_p12 = scmp.eq.s32.totalorder %s3112_s23, 1  ;;  %p59_p13 = scmp.eq.s32.totalorder %s56_s15, 0 }
  0x45   : > { %s3670_s12 = scalar_select %p3173_p10, 1, 0 }
  0x46   : > { %p330_p0 = scmp.eq.s32.totalorder %s2328_s11, 1  ;;  %p3180_p2 = por %p324_p12, %p68_p3 }
  0x47   : > { %p2563_p4 = scmp.lt.s32.totalorder %s2995_s22, 2  ;;  %s3643_s28 = sand.u32 1, %s2983_s19  }
  0x48   : > { %s3671_s16 = scalar_select %p3180_p2, 1, 0 }
  0x49   : > { %s3186_s25 = scalar_select %p59_p13, %s2983_s19, %s61_s30  }
  0x4a   : > { %p3188_p1 = por %p330_p0, %p74_p8  ;;  %s3195_s3 = sshll.u32 %s3643_s28, 2 }
  0x4b   : > { %3672 = sst [smem:[#allocation32_spill]] %s3186_s25  ;;  %s3198_s5 = sshll.u32 %s2991_s21, 6 }
  0x4c   : > { %s3673_s26 = scalar_select %p3188_p1, 1, 0 }
  0x4d   : > { %p3202_p3 = pnand %p2563_p4, %p3167_p9  ;;  %s447_s30 = sand.u32 1, %s2995_s22  }
  0x4e   : > { %3674 = sst [smem:[#allocation33_spill]] %s3673_s26  ;;  %s457_s29 = scalar_lea.hbm %s3627_s1, %s3198_s5 }
  0x4f   : > { %s451_s25 = scalar_lea.vmem [#allocation9], %s3195_s3  ;;  %s3002_s28 = smov [#allocation14]  }
  0x50   : > { %s459_s26 = sshll.u32 %s451_s25, 4  ;;  %s363_s17 = sshll.u32 %s3002_s28, 4  ;;  %s460_s26 = int_to_ptr.vmem [resolvable:$true] %s459_s26  ;;  %s364_s17 = int_to_ptr.vmem [resolvable:$true] %s363_s17 }
  0x51   : > { %s3212_s21 = scalar_lea.sflag [#allocation10], %s447_s30  ;;  %p3648_p5 = pneg %p3202_p3 }
  0x52   : > { %s2750_s14 = scalar_lea.vmem %s460_s26, 64  ;;  %s3003_s22 = smov [#allocation9]  }
  0x53   : > { %p2751_p8 = scmp.ne.s32.totalorder %s460_s26, %s2750_s14  ;;  %s2755_s10 = sshll.u32 %s3003_s22, 4  ;;  %s2756_s10 = int_to_ptr.vmem [resolvable:$false] %s2755_s10 }
  0x54   : > { %s2757_s7 = scalar_lea.vmem %s2756_s10, 128  ;;  %p2758_p12 = scmp.lt.s32.totalorder %s460_s26, %s2756_s10 }
  0x55   : > { %p2753_p9 = pnand %p2751_p8, %p3648_p5  ;;  %p2759_p13 = scmp.lt.s32.totalorder %s2757_s7, %s2750_s14 }
  0x57   : > { %p2754_p11 = pneg %p2753_p9  ;;  %p2760_p0 = por %p2759_p13, %p2758_p12 }
  0x59   : > { %p2761_p4 = pnand %p2760_p0, %p2754_p11 }
  0x5b   : > { %2764 = shalt.err (!%p2761_p4)
}
  0x5c   : > { %2549 = dma.hbm_to_vmem [thread:$0]  (!%p3202_p3), %s457_s29, 64, %s460_s26, %s3212_s21  }
  0x5d   : > { %s2776_s25 = scalar_lea.vmem %s364_s17, 16  ;;  %s2783_s28 = scalar_lea.vmem %s364_s17, 32 }
  0x5e   : > { %p2777_p1 = scmp.ne.s32.totalorder %s364_s17, %s2776_s25  ;;  %p2784_p5 = scmp.lt.s32.totalorder %s364_s17, %s364_s17 }
  0x5f   : > { %p2785_p2 = scmp.lt.s32.totalorder %s2783_s28, %s2776_s25 }
  0x60   : > { %p2779_p8 = pnand %p2777_p1, %p3132_p7 }
  0x61   : > { %p2786_p10 = por %p2785_p2, %p2784_p5 }
  0x62   : > { %p2780_p9 = pneg %p2779_p8 }
  0x64   : > { %p2787_p6 = pnand %p2786_p10, %p2780_p9 }
  0x66   : > { %2790 = shalt.err (!%p2787_p6)
}
  0x67   : > { %p3676_p11 = scmp.ne.s32.totalorder %s3662_s27, 0  ;;  %s3004_s29 = smov [#allocation17]  }
  0x68   : > { %s387_s26 = sshll.u32 %s3004_s29, 4  ;;  %s3005_s30 = smov [#allocation20]   ;;  %s388_s26 = int_to_ptr.vmem [resolvable:$true] %s387_s26 }
  0x69   : > { %2530 = dma.hbm_to_vmem [thread:$0]  (!%p3676_p11), %s3630_s4, 16, %s364_s17, [#allocation13]  }
  0x6a   : > { %s411_s15 = sshll.u32 %s3005_s30, 4  ;;  %s2802_s14 = scalar_lea.vmem %s388_s26, 16  ;;  %s412_s15 = int_to_ptr.vmem [resolvable:$true] %s411_s15 }
  0x6b   : > { %p2803_p1 = scmp.ne.s32.totalorder %s388_s26, %s2802_s14  ;;  %s2809_s7 = scalar_lea.vmem %s388_s26, 32 }
  0x6c   : > { %p2810_p10 = scmp.lt.s32.totalorder %s388_s26, %s388_s26  ;;  %p2811_p6 = scmp.lt.s32.totalorder %s2809_s7, %s2802_s14 }
  0x6d   : > { %p2805_p12 = pnand %p2803_p1, %p3132_p7 }
  0x6e   : > { %p2812_p2 = por %p2811_p6, %p2810_p10 }
  0x6f   : > { %p2806_p13 = pneg %p2805_p12 }
  0x71   : > { %p2813_p5 = pnand %p2812_p2, %p2806_p13 }
  0x73   : > { %2816 = shalt.err (!%p2813_p5)
}
  0x74   : > { %2536 = dma.hbm_to_vmem [thread:$0]  (!%p3676_p11), %s3632_s6, 16, %s388_s26, [#allocation16]  }
  0x75   : > { %s2828_s28 = scalar_lea.vmem %s412_s15, 16  ;;  %s2835_s10 = scalar_lea.vmem %s412_s15, 32 }
  0x76   : > { %p2829_p0 = scmp.ne.s32.totalorder %s412_s15, %s2828_s28  ;;  %p2836_p9 = scmp.lt.s32.totalorder %s412_s15, %s412_s15 }
  0x77   : > { %p2837_p1 = scmp.lt.s32.totalorder %s2835_s10, %s2828_s28 }
  0x78   : > { %p2831_p4 = pnand %p2829_p0, %p3132_p7 }
  0x79   : > { %p2838_p12 = por %p2837_p1, %p2836_p9 }
  0x7a   : > { %p2832_p8 = pneg %p2831_p4 }
  0x7c   : > { %p2839_p10 = pnand %p2838_p12, %p2832_p8 }
  0x7e   : > { %2842 = shalt.err (!%p2839_p10)
}
  0x7f   : > { %2542 = dma.hbm_to_vmem [thread:$0]  (!%p3676_p11), %s3634_s8, 16, %s412_s15, [#allocation19]  }
  0x80   : > { %s438_s30 = scalar_lea.hbm %s3626_s0, %s3198_s5  ;;  %s432_s14 = scalar_lea.vmem [#allocation6], %s3195_s3 }
  0x81   : > { %s440_s7 = sshll.u32 %s432_s14, 4  ;;  %s476_s27 = scalar_lea.hbm %s3628_s2, %s3198_s5  ;;  %s441_s7 = int_to_ptr.vmem [resolvable:$true] %s440_s7 }
  0x82   : > { %s3677_s28 = sand.u32 1, %s2983_s19   ;;  %s2856_s22 = scalar_lea.vmem %s441_s7, 64 }
  0x83   : > { %s429_s10 = scalar_lea.sflag [#allocation7], %s3677_s28  ;;  %p2857_p7 = scmp.ne.s32.totalorder %s441_s7, %s2856_s22 }
  0x84   : > { %p3678_p13 = pneg %p3202_p3  ;;  %s3006_s15 = smov [#allocation6]  }
  0x85   : > { %s2861_s29 = sshll.u32 %s3006_s15, 4  ;;  %s2862_s29 = int_to_ptr.vmem [resolvable:$false] %s2861_s29 }
  0x86   : > { %p2859_p6 = pnand %p2857_p7, %p3678_p13  ;;  %s2863_s13 = scalar_lea.vmem %s2862_s29, 128 }
  0x87   : > { %p2864_p11 = scmp.lt.s32.totalorder %s441_s7, %s2862_s29  ;;  %p2865_p5 = scmp.lt.s32.totalorder %s2863_s13, %s2856_s22 }
  0x88   : > { %p2860_p2 = pneg %p2859_p6 }
  0x89   : > { %p2866_p0 = por %p2865_p5, %p2864_p11 }
  0x8b   : > { %p2867_p4 = pnand %p2866_p0, %p2860_p2 }
  0x8d   : > { %2870 = shalt.err (!%p2867_p4)
}
  0x8e   : > { %2546 = dma.hbm_to_vmem [thread:$0]  (!%p3202_p3), %s438_s30, 64, %s441_s7, %s429_s10  }
  0x8f   : > { %s470_s26 = scalar_lea.vmem [#allocation11], %s3195_s3  ;;  %p3679_p9 = pmov %p3678_p13 }
  0x90   : > { %s478_s14 = sshll.u32 %s470_s26, 4  ;;  %s3007_s17 = smov [#allocation11]   ;;  %s479_s14 = int_to_ptr.vmem [resolvable:$true] %s478_s14 }
  0x91   : > { %s2884_s25 = scalar_lea.vmem %s479_s14, 64  ;;  %s2889_s28 = sshll.u32 %s3007_s17, 4  ;;  %s2890_s28 = int_to_ptr.vmem [resolvable:$false] %s2889_s28 }
  0x92   : > { %p2885_p8 = scmp.ne.s32.totalorder %s479_s14, %s2884_s25  ;;  %s2891_s22 = scalar_lea.vmem %s2890_s28, 128 }
  0x93   : > { %p2892_p10 = scmp.lt.s32.totalorder %s479_s14, %s2890_s28  ;;  %p2893_p7 = scmp.lt.s32.totalorder %s2891_s22, %s2884_s25 }
  0x94   : > { %p2887_p1 = pnand %p2885_p8, %p3679_p9 }
  0x95   : > { %p2894_p13 = por %p2893_p7, %p2892_p10 }
  0x96   : > { %p2888_p12 = pneg %p2887_p1 }
  0x98   : > { %p2895_p6 = pnand %p2894_p13, %p2888_p12 }
  0x9a   : > { %2898 = shalt.err (!%p2895_p6)
}
  0x9b   : > { %2552 = dma.hbm_to_vmem [thread:$0]  (!%p3202_p3), %s476_s27, 64, %s479_s14, %s3212_s21  }
  0x9c   : > { %p3680_p2 = scmp.ne.s32.totalorder %s3661_s24, 0 }
  0x9d   : > { %s3274_s7 = sand.u32 (!%p3680_p2), 1, %s2979_s18   ;;  %p3681_p11 = scmp.ne.s32.totalorder (!%p3680_p2), %s3670_s12, 0 }
  0x9e   : > { %487 = sbr.rel (%p3680_p2) target bundleno = 1670 (0x686), region = 64  ;;  %s3277_s10 = sshll.u32 (!%p3680_p2), %s3274_s7, 2 }
  0x9f   : > { %s490_s11 = scalar_lea.sflag (!%p3680_p2), [#allocation7], %s3274_s7  ;;  %s493_s15 = scalar_lea.vmem (!%p3680_p2), [#allocation6], %s3277_s10 }
  0xa3   : > { %2950 = dma.done.wait (%p3681_p11), %s490_s11, 64  }
  0xa4   : > { %2952 = vsyncadd (%p3681_p11), %s490_s11, 4294967232  ;;  %s498_s5 = sand.u32 1, %s3112_s23   ;;  %s502_s24 = scalar_lea.vmem [#allocation9], %s3277_s10 }
  0xa5   : > { %s499_s21 = scalar_lea.sflag [#allocation10], %s498_s5 }
  0xa6   : > { %2954 = dma.done.wait (%p3681_p11), %s499_s21, 128  }
  0xa7   : > { %2956 = vsyncadd (%p3681_p11), %s499_s21, 4294967168  ;;  %s511_s27 = scalar_lea.vmem [#allocation11], %s3277_s10  ;;  %p3682_p3 = scmp.eq.s32.totalorder %s3112_s23, 0 }
  0xa9   : > { %2958 = dma.done.wait (%p3682_p3), [#allocation13], 272   ;;  %p3683_p5 = pmov %p3682_p3 }
  0xaa   : > { %p3684_p0 = pmov %p3682_p3 }
  0xab   : > { %2960 = vsyncadd (%p3683_p5), [#allocation13], 4294967024 }
  0xac   : > { %2962 = dma.done.wait (%p3684_p0), [#allocation16], 272   ;;  %p3685_p4 = pmov %p3684_p0 }
  0xad   : > { %p3686_p8 = pmov %p3684_p0 }
  0xae   : > { %2964 = vsyncadd (%p3685_p4), [#allocation16], 4294967024 }
  0xaf   : > { %2966 = dma.done.wait (%p3686_p8), [#allocation19], 272   ;;  %p3687_p9 = pmov %p3684_p0 }
  0xb0   : > { %v3008_v0 = vmov 0.0   ;;  %vm3009_vm0 = vmmov 0   ;;  %v2639_v1 = vld [vmem:[#allocation12 + $0x8] sm:$0xff]   ;;  %v2640_v2 = vld [vmem:[#allocation15 + $0x8] sm:$0xff]   ;;  %v2642_v4 = vld [vmem:[#allocation15] sm:$0xff]   ;;  %vm613_vm1 = vcmask 261120   ;;  %v668_v26 = vlaneseq }
  0xb1   : > { %2968 = vsyncadd (%p3687_p9), [#allocation19], 4294967024  ;;  %2412 = vmatprep.subr.bf16.mxu0 %v3008_v0  ;;  %2420 = vmatprep.subr.bf16.mxu1 %v3008_v0  ;;  %v2641_v3 = vld [vmem:[#allocation12] sm:$0xff]   ;;  %v589_v5 = vld [vmem:[%s493_s15] sm:$0xf]  ;;  %vm830_vm2 = vcmask 60416  }
  0xb2   : > { %2416 = vmatprep.mubr.msk.bf16.mxu0 %vm3009_vm0, %v3008_v0  ;;  %2424 = vmatprep.mubr.msk.bf16.mxu1 %vm3009_vm0, %v3008_v0  ;;  %v842_v6 = vld [vmem:[%s502_s24] sm:$0xf]  ;;  %v2358_v8 = vld [vmem:[#allocation17] ss:$0 sm:$0xff]  ;;  %836 = vst.msk [vmem:[#allocation4] sm:$0xf] %vm830_vm2, %v3008_v0 }
  0xb3   : > { %2413 = vmatpush3.bf16.msra.mxu0 %v2639_v1  ;;  %2421 = vmatpush3.bf16.msra.mxu1 %v2640_v2  ;;  %v2354_v7 = vld [vmem:[#allocation14] ss:$0 sm:$0xff]  ;;  %s3010_s23 = smov 104   ;;  %s3011_s12 = smov 120   ;;  %v2644_v22 = vld [vmem:[#allocation18] sm:$0xff]   ;;  %vm837_vm3 = vcmask 64512  }
  0xb4   : > { %2414 = vmatprep.subr.bf16.mxu0 %v3008_v0  ;;  %2422 = vmatprep.subr.bf16.mxu1 %v3008_v0  ;;  %s3012_s29 = smov 112   ;;  %v2643_v21 = vld [vmem:[#allocation18 + $0x8] sm:$0xff]   ;;  %v843_v23 = vld [vmem:[%s511_s27] sm:$0xf]  ;;  %838 = vst.msk [vmem:[#allocation5] sm:$0xff] %vm837_vm3, %v3008_v0  ;;  %839 = vst.msk [vmem:[#allocation5 + $0x8] sm:$0xff] %vm837_vm3, %v3008_v0 }
  0xb5   : > { %840 = vst.msk [vmem:[#allocation5 + $0x10] sm:$0xff] %vm837_vm3, %v3008_v0  ;;  %841 = vst.msk [vmem:[#allocation5 + $0x18] sm:$0xff] %vm837_vm3, %v3008_v0  ;;  %v3013_v24 = vmov 1983009808   ;;  %v3014_v27 = vmov 1934713408  }
  0xb6   : > { %v666_v25 = vunpack.c.l.s4 %v3013_v24  ;;  %v683_v28 = vunpack.c.l.s4 %v3014_v27  ;;  %v3344_v30 = vshrl.u32 %v668_v26, 7  ;;  %v3015_v46 = vmov 0   ;;  %s3017_s17 = smov 16   ;;  %s3018_s28 = smov 8  }
  0xb7   : > { %2415 = vmatpush3.bf16.msra.mxu0 %v2641_v3  ;;  %2423 = vmatpush3.bf16.msra.mxu1 %v2642_v4  ;;  %vm1539_vm4 = vcmask 1041409   ;;  %vm1541_vm5 = vcmask 1042434   ;;  %vm1543_vm6 = vcmask 1043459   ;;  %vm1638_vm7 = vcmask 1043456   ;;  %s3019_s22 = smov 24   ;;  %s2353_s3 = sshll.u32 %s3274_s7, 3 }
  0xb8   : > { %2428 = vmatprep.subr.bf16.mxu0 %v3008_v0  ;;  %2436 = vmatprep.subr.bf16.mxu1 %v3008_v0  ;;  %v667_v29 = vunpack.c.0.s8 %v666_v25  ;;  %v684_v31 = vunpack.c.0.s8 %v683_v28  ;;  %vm2055_vm8 = vcmask 130048   ;;  %vm2057_vm9 = vcmask 195584   ;;  %s3688_s11 = sld [smem:[#allocation37_spill]]  ;;  %s2381_s15 = sshll.u32 %s2987_s20, 7 }
  0xb9   : > { %s583_s5 = scalar_lea.vmem [#allocation21], %s2353_s3  ;;  %p3690_p12 = scmp.ne.s32.totalorder %s3671_s16, 0 }
  0xba   : > { %2417 = vmatmul.mubr.msk.bf16.vlgmr.msra.gmra.mxu0 %vm613_vm1, %v589_v5  ;;  %2425 = vmatmul.mubr.msk.bf16.vlgmr.msra.gmra.mxu1 %vm613_vm1, %v842_v6  ;;  %v3347_v32 = vsub.s32 %v667_v29, %v3344_v30  ;;  %v3351_v36 = vsub.s32 %v684_v31, %v3344_v30  ;;  %s2142_s21 = sshll.u32 %s583_s5, 4  ;;  %s3020_s13 = smov [#allocation21]   ;;  %s3579_s21 = int_to_ptr.vmem [resolvable:$true] %s2142_s21 }
  0xbb   : > { %2432 = vmatprep.mubr.msk.bf16.mxu0 %vm3009_vm0, %v3008_v0  ;;  %2438 = vmatprep.mubr.msk.bf16.mxu1 %vm3009_vm0, %v3008_v0  ;;  %s2899_s20 = scalar_lea.vmem %s3579_s21, 128  ;;  %s2903_s26 = sshll.u32 %s3020_s13, 4  ;;  %s2904_s26 = int_to_ptr.vmem [resolvable:$false] %s2903_s26 }
  0xbc   : > { %2429 = vmatpush3.bf16.msra.mxu0 %v2643_v21  ;;  %p2900_p1 = scmp.ne.s32.totalorder %s3579_s21, %s2899_s20  ;;  %s2905_s14 = scalar_lea.vmem %s2904_s26, 256 }
  0xbd   : > { %2430 = vmatprep.subr.bf16.mxu0 %v3008_v0  ;;  %p2906_p13 = scmp.lt.s32.totalorder %s3579_s21, %s2904_s26  ;;  %p2907_p6 = scmp.lt.s32.totalorder %s2905_s14, %s2899_s20 }
  0xbe   : > { %p2901_p10 = pnand %p2900_p1, %p3690_p12 }
  0xbf   : > { %p2908_p2 = por %p2907_p6, %p2906_p13 }
  0xc0   : > { %2431 = vmatpush3.bf16.msra.mxu0 %v2644_v22  ;;  %p2902_p7 = pneg %p2901_p10 }
  0xc1   : > { %2442 = vmatprep.subr.bf16.mxu0 %v3008_v0 }
  0xc2   : > { %p2909_p11 = pnand %p2908_p2, %p2902_p7 }
  0xc3   : > { %2433 = vmatmul.mubr.msk.bf16.vlgmr.msra.gmra.mxu0 %vm613_vm1, %v843_v23 }
  0xc4   : > { %2444 = vmatprep.mubr.msk.bf16.mxu0 %vm3009_vm0, %v3008_v0 }
 0x17a   : > { %v651_v9 = vpop.f32.mrf.mxu0  ;;  %v905_v11 = vpop.f32.mrf.mxu1 }
 0x17b   : > { %v652_v10 = vadd.f32 %v2354_v7, %v651_v9  ;;  %v906_v12 = vadd.f32 %v2358_v8, %v905_v11 }
 0x17c   : > { %v2418_v13 = vpop.f32.mrf.mxu0  ;;  %v2426_v15 = vpop.f32.mrf.mxu1 }
 0x17d   : > { %v657_v14 = vpack.c.bf16 %v652_v10, %v652_v10  ;;  %v977_v17 = vpack.c.bf16 %v906_v12, %v906_v12 }
 0x17e   : > { %v654_v16 = vpop.f32.mrf.mxu0  ;;  %v908_v18 = vpop.f32.mrf.mxu1 }
 0x17f   : > { %663 = vrot.lane.b32.xlu1 %v657_v14, %s3010_s23  ;;  %659 = vrot.lane.b32.xlu0 %v657_v14, %s3011_s12  ;;  %v671_v45 = vrot.slane %v657_v14, %v3347_v32  ;;  %v991_v53 = vrot.slane %v977_v17, %v3347_v32 }
 0x180   : > { %v2419_v19 = vpop.f32.mrf.mxu0  ;;  %v2427_v20 = vpop.f32.mrf.mxu1 }
 0x183   : > { %979 = vrot.lane.b32.xlu1 %v977_v17, %s3011_s12  ;;  %661 = vrot.lane.b32.xlu0 %v657_v14, %s3012_s29 }
 0x187   : > { %983 = vrot.lane.b32.xlu1 %v977_v17, %s3010_s23  ;;  %981 = vrot.lane.b32.xlu0 %v977_v17, %s3012_s29 }
 0x1f1   : > { %v664_v33 = vpop.permute.xlu1 %663  ;;  %v660_v34 = vpop.permute.xlu0 %659 }
 0x1f2   : > { %v713_v35 = vrot.slane %v664_v33, %v3347_v32  ;;  %v705_v37 = vrot.slane %v660_v34, %v3347_v32 }
 0x1f4   : > { %v714_v38 = vcombine.low %v705_v37, %v713_v35  ;;  %v715_v39 = vcombine.high %v705_v37, %v713_v35 }
 0x1f5   : > { %v980_v40 = vpop.permute.xlu1 %979  ;;  %v662_v41 = vpop.permute.xlu0 %661 }
 0x1f6   : > { %v722_v42 = vrot.slane %v714_v38, %v3351_v36  ;;  %v729_v43 = vrot.slane %v715_v39, %v3351_v36  ;;  %v679_v44 = vrot.slane %v662_v41, %v3347_v32  ;;  %v1025_v49 = vrot.slane %v980_v40, %v3347_v32 }
 0x1f8   : > { %v730_v47 = vcombine.high %v722_v42, %v3015_v46  ;;  %v731_v48 = vcombine.high %v729_v43, %v3015_v46  ;;  %v680_v50 = vcombine.low %v671_v45, %v679_v44  ;;  %v681_v51 = vcombine.high %v671_v45, %v679_v44 }
 0x1f9   : > { %v984_v52 = vpop.permute.xlu1 %983  ;;  %v982_v54 = vpop.permute.xlu0 %981  ;;  %v737_v55 = vshrl.u32 %v722_v42, 16  ;;  %v753_v56 = vshrl.u32 %v729_v43, 16 }
 0x1fa   : > { %v1033_v57 = vrot.slane %v984_v52, %v3347_v32  ;;  %v999_v58 = vrot.slane %v982_v54, %v3347_v32  ;;  %v745_v59 = vshrl.u32 %v730_v47, 16  ;;  %v761_v60 = vshrl.u32 %v731_v48, 16 }
 0x1fb   : > { %v688_v61 = vrot.slane %v680_v50, %v3351_v36  ;;  %v695_v62 = vrot.slane %v681_v51, %v3351_v36 }
 0x1fc   : > { %v1034_v63 = vcombine.low %v1025_v49, %v1033_v57  ;;  %v1035_v1 = vcombine.high %v1025_v49, %v1033_v57  ;;  %v1000_v2 = vcombine.low %v991_v53, %v999_v58  ;;  %v1001_v3 = vcombine.high %v991_v53, %v999_v58 }
 0x1fd   : > { %v696_v4 = vcombine.high %v688_v61, %v3015_v46  ;;  %v697_v5 = vcombine.high %v695_v62, %v3015_v46  ;;  %v734_v6 = vpack.i.b16 %v722_v42, %v688_v61  ;;  %v736_v7 = vshrl.u32 %v688_v61, 16 }
 0x1fe   : > { %v750_v8 = vpack.i.b16 %v729_v43, %v695_v62  ;;  %v752_v9 = vshrl.u32 %v695_v62, 16  ;;  %v1042_v10 = vrot.slane %v1034_v63, %v3351_v36  ;;  %v1049_v11 = vrot.slane %v1035_v1, %v3351_v36 }
 0x1ff   : > { %v738_v12 = vpack.i.b16 %v737_v55, %v736_v7  ;;  %v742_v13 = vpack.i.b16 %v730_v47, %v696_v4  ;;  %v744_v14 = vshrl.u32 %v696_v4, 16  ;;  %v758_v15 = vpack.i.b16 %v731_v48, %v697_v5 }
 0x200   : > { %v754_v16 = vpack.i.b16 %v753_v56, %v752_v9  ;;  %v760_v17 = vshrl.u32 %v697_v5, 16  ;;  %v764_v18 = vcombine.low %v734_v6, %v750_v8  ;;  %v1050_v19 = vcombine.high %v1042_v10, %v3015_v46 }
 0x201   : > { %v746_v20 = vpack.i.b16 %v745_v59, %v744_v14  ;;  %v772_v21 = vcombine.low %v742_v13, %v758_v15  ;;  %v1051_v22 = vcombine.high %v1049_v11, %v3015_v46  ;;  %v1057_v27 = vshrl.u32 %v1042_v10, 16 }
 0x202   : > { %v762_v23 = vpack.i.b16 %v761_v60, %v760_v17  ;;  %v771_v24 = vrot.slane %v764_v18, %v3347_v32  ;;  %v789_v25 = vcombine.low %v738_v12, %v754_v16  ;;  %v1065_v29 = vshrl.u32 %v1050_v19, 16 }
 0x203   : > { %v779_v28 = vrot.slane %v772_v21, %v3347_v32  ;;  %v1073_v31 = vshrl.u32 %v1049_v11, 16  ;;  %v1008_v33 = vrot.slane %v1000_v2, %v3351_v36  ;;  %v1081_v37 = vshrl.u32 %v1051_v22, 16 }
 0x204   : > { %v796_v34 = vrot.slane %v789_v25, %v3347_v32  ;;  %v797_v35 = vcombine.low %v746_v20, %v762_v23  ;;  %v1015_v38 = vrot.slane %v1001_v3, %v3351_v36 }
 0x205   : > { %v780_v39 = vcombine.low %v771_v24, %v779_v28  ;;  %v1016_v40 = vcombine.high %v1008_v33, %v3015_v46  ;;  %v1054_v41 = vpack.i.b16 %v1042_v10, %v1008_v33  ;;  %v1056_v42 = vshrl.u32 %v1008_v33, 16 }
 0x206   : > { %v804_v43 = vrot.slane %v797_v35, %v3347_v32  ;;  %v1017_v44 = vcombine.high %v1015_v38, %v3015_v46  ;;  %v1070_v45 = vpack.i.b16 %v1049_v11, %v1015_v38  ;;  %v1072_v47 = vshrl.u32 %v1015_v38, 16 }
 0x207   : > { %v787_v48 = vrot.slane %v780_v39, %v3351_v36  ;;  %v1058_v49 = vpack.i.b16 %v1057_v27, %v1056_v42  ;;  %v1062_v50 = vpack.i.b16 %v1050_v19, %v1016_v40  ;;  %v1064_v51 = vshrl.u32 %v1016_v40, 16  ;;  %v971_v40 = vpop.f32.mrf.mxu0 }
 0x208   : > { %v805_v52 = vcombine.low %v796_v34, %v804_v43  ;;  %v1074_v53 = vpack.i.b16 %v1073_v31, %v1072_v47  ;;  %v1078_v54 = vpack.i.b16 %v1051_v22, %v1017_v44  ;;  %v1080_v55 = vshrl.u32 %v1017_v44, 16 }
 0x209   : > { %v788_v56 = vcombine.high %v787_v48, %v3015_v46  ;;  %v1066_v57 = vpack.i.b16 %v1065_v29, %v1064_v51  ;;  %v1084_v58 = vcombine.low %v1054_v41, %v1070_v45  ;;  %v818_v63 = vshrl.u32 %v787_v48, 16  ;;  %v2434_v41 = vpop.f32.mrf.mxu0 }
 0x20a   : > { %v812_v59 = vrot.slane %v805_v52, %v3351_v36  ;;  %v1082_v60 = vpack.i.b16 %v1081_v37, %v1080_v55  ;;  %v1092_v61 = vcombine.low %v1062_v50, %v1078_v54  ;;  %v1109_v62 = vcombine.low %v1058_v49, %v1074_v53 }
 0x20b   : > { %v826_v5 = vshrl.u32 %v788_v56, 16  ;;  %v1091_v6 = vrot.slane %v1084_v58, %v3347_v32  ;;  %v974_v42 = vpop.f32.mrf.mxu0 }
 0x20c   : > { %v813_v1 = vcombine.high %v812_v59, %v3015_v46  ;;  %v816_v2 = vpack.i.b16 %v812_v59, %v787_v48  ;;  %v819_v3 = vshrl.u32 %v812_v59, 16  ;;  %v1117_v4 = vcombine.low %v1066_v57, %v1082_v60  ;;  %v2362_v59 = vld [vmem:[#allocation20] ss:$0 sm:$0xff] }
 0x20d   : > { %v1099_v7 = vrot.slane %v1092_v61, %v3347_v32  ;;  %v1116_v8 = vrot.slane %v1109_v62, %v3347_v32  ;;  %v2435_v43 = vpop.f32.mrf.mxu0 }
 0x20e   : > { %v820_v9 = vpack.i.b16 %v819_v3, %v818_v63  ;;  %v824_v10 = vpack.i.b16 %v813_v1, %v788_v56  ;;  %v827_v11 = vshrl.u32 %v813_v1, 16  ;;  %831 = vst.msk [vmem:[#allocation2] sm:$0xf] %vm830_vm2, %v816_v2  ;;  %v1124_v12 = vrot.slane %v1117_v4, %v3347_v32 }
 0x20f   : > { %v1100_v13 = vcombine.low %v1091_v6, %v1099_v7  ;;  %v972_v2 = vadd.f32 %v2362_v59, %v971_v40  ;;  %v1522_v7 = vand.u32 127, %v668_v26 }
 0x210   : > { %v828_v14 = vpack.i.b16 %v827_v11, %v826_v5  ;;  %832 = vst.msk [vmem:[#allocation2 + $0x4] sm:$0xf] %vm830_vm2, %v820_v9  ;;  %833 = vst.msk [vmem:[#allocation2 + $0x8] sm:$0xf] %vm830_vm2, %v824_v10  ;;  %v1125_v15 = vcombine.low %v1116_v8, %v1124_v12  ;;  %v3016_v5 = vmov -inf  }
 0x211   : > { %v1107_v16 = vrot.slane %v1100_v13, %v3351_v36  ;;  %v1146_v4 = vpack.c.bf16 %v972_v2, %v972_v2  ;;  %835 = vst.msk [vmem:[#allocation3] sm:$0xf] %vm830_vm2, %v3016_v5  ;;  %v3438_v10 = vsub.s32 %v1522_v7, %v3344_v30 }
 0x212   : > { %834 = vst.msk [vmem:[#allocation2 + $0xc] sm:$0xf] %vm830_vm2, %v828_v14  ;;  %v1132_v17 = vrot.slane %v1125_v15, %v3351_v36 }
 0x213   : > { %v1137_v19 = vshrl.u32 %v1107_v16, 16  ;;  %v1108_v24 = vcombine.high %v1107_v16, %v3015_v46 }
 0x214   : > { %v1136_v18 = vpack.i.b16 %v1132_v17, %v1107_v16  ;;  %v1138_v20 = vshrl.u32 %v1132_v17, 16  ;;  %v1133_v21 = vcombine.high %v1132_v17, %v3015_v46 }
 0x215   : > { %v1143_v29 = vshrl.u32 %v1108_v24, 16  ;;  %v1315_v33 = vld [vmem:[#allocation2] sm:$0xf] }
 0x216   : > { %v1324_v22 = vsel %vm837_vm3, %v1136_v18, 0  ;;  %v1139_v23 = vpack.i.b16 %v1138_v20, %v1137_v19  ;;  %v1144_v27 = vshrl.u32 %v1133_v21, 16  ;;  %v1142_v28 = vpack.i.b16 %v1133_v21, %v1108_v24 }
 0x217   : > { %2437 = vmatpush3.bf16.xpose.msra.mxu1 %v1324_v22  ;;  %v1316_v35 = vld [vmem:[#allocation2 + $0x4] sm:$0xf]  ;;  %v1317_v38 = vld [vmem:[#allocation2 + $0x8] sm:$0xf]  ;;  %v3454_v24 = vsub.s32 0, %v3344_v30 }
 0x218   : > { %v1370_v25 = vsel %vm837_vm3, %v1139_v23, 0  ;;  %2448 = vmatprep.subr.bf16.mxu1 %v3008_v0  ;;  %v1145_v31 = vpack.i.b16 %v1144_v27, %v1143_v29  ;;  %v1416_v34 = vsel %vm837_vm3, %v1142_v28, 0  ;;  %v3446_v20 = vld [vmem:[#allocation3] sm:$0xf]  ;;  %v3451_v23 = vsub.s32 1, %v3344_v30 }
 0x219   : > { %2443 = vmatpush3.bf16.xpose.msra.mxu0 %v1370_v25  ;;  %v1318_v39 = vld [vmem:[#allocation2 + $0xc] sm:$0xf] }
 0x21a   : > { %2454 = vmatprep.subr.bf16.mxu0 %v3008_v0  ;;  %v1462_v37 = vsel %vm837_vm3, %v1145_v31, 0 }
 0x21e   : > { %2439 = vmatmul.mubr.msk.bf16.vlgmr.msra.gmra.mxu1 %vm837_vm3, %v1315_v33  ;;  %v1160_v33 = vrot.slane %v1146_v4, %v3347_v32 }
 0x21f   : > { %2449 = vmatpush3.bf16.xpose.msra.mxu1 %v1416_v34  ;;  %2450 = vmatprep.mubr.msk.bf16.mxu1 %vm3009_vm0, %v3008_v0  ;;  %v3463_v34 = vsub.s32 3, %v3344_v30 }
 0x220   : > { %2445 = vmatmul.mubr.msk.bf16.vlgmr.msra.gmra.mxu0 %vm837_vm3, %v1316_v35  ;;  %2460 = vmatprep.subr.bf16.mxu1 %v3008_v0  ;;  %v3466_v35 = vsub.s32 2, %v3344_v30 }
 0x221   : > { %2455 = vmatpush3.bf16.xpose.msra.mxu0 %v1462_v37  ;;  %2456 = vmatprep.mubr.msk.bf16.mxu0 %vm3009_vm0, %v3008_v0 }
 0x222   : > { %2466 = vmatprep.subr.bf16.mxu0 %v3008_v0 }
 0x226   : > { %2451 = vmatmul.mubr.msk.bf16.vlgmr.msra.gmra.mxu1 %vm837_vm3, %v1317_v38 }
 0x227   : > { %2462 = vmatprep.mubr.msk.bf16.mxu1 %vm3009_vm0, %v3008_v0 }
 0x228   : > { %2457 = vmatmul.mubr.msk.bf16.vlgmr.msra.gmra.mxu0 %vm837_vm3, %v1318_v39 }
 0x229   : > { %2468 = vmatprep.mubr.msk.bf16.mxu0 %vm3009_vm0, %v3008_v0 }
 0x2de   : > { %v3416_v44 = vpop.f32.mrf.mxu1 }
 0x2df   : > { %v1505_v45 = vsel %vm837_vm3, %v3416_v44, -inf }
 0x2e0   : > { %1506 = vmax.xlane.f32.xlu0 %v1505_v45  ;;  %v2440_v47 = vpop.f32.mrf.mxu1  ;;  %v3420_v48 = vpop.f32.mrf.mxu0 }
 0x2e1   : > { %v1508_v49 = vsel %vm837_vm3, %v3420_v48, -inf }
 0x2e2   : > { %v1363_v50 = vpop.f32.mrf.mxu1  ;;  %1509 = vmax.xlane.f32.xlu1 %v1508_v49  ;;  %v2446_v51 = vpop.f32.mrf.mxu0 }
 0x2e4   : > { %v2441_v52 = vpop.f32.mrf.mxu1  ;;  %v1409_v53 = vpop.f32.mrf.mxu0 }
 0x2e6   : > { %v2447_v54 = vpop.f32.mrf.mxu0  ;;  %v3424_v55 = vpop.f32.mrf.mxu1 }
 0x2e7   : > { %v1511_v56 = vsel %vm837_vm3, %v3424_v55, -inf }
 0x2e8   : > { %1512 = vmax.xlane.f32.xlu0 %v1511_v56  ;;  %v2452_v57 = vpop.f32.mrf.mxu1  ;;  %v3428_v58 = vpop.f32.mrf.mxu0 }
 0x2e9   : > { %v1514_v62 = vsel %vm837_vm3, %v3428_v58, -inf }
 0x2ea   : > { %v1455_v60 = vpop.f32.mrf.mxu1  ;;  %v2458_v61 = vpop.f32.mrf.mxu0 }
 0x2ec   : > { %v2453_v63 = vpop.f32.mrf.mxu1  ;;  %1515 = vmax.xlane.f32.xlu0 %v1514_v62  ;;  %v1501_v1 = vpop.f32.mrf.mxu0 }
 0x2ee   : > { %v2459_v3 = vpop.f32.mrf.mxu0 }
 0x2f3   : > { %1148 = vrot.lane.b32.xlu1 %v1146_v4, %s3011_s12 }
 0x2f7   : > { %1152 = vrot.lane.b32.xlu1 %v1146_v4, %s3010_s23  ;;  %s3689_s23 = sld [smem:[#allocation38_spill]] }
 0x2fd   : > { %s3577_s12 = scalar_lea.hbm %s3689_s23, %s2381_s15 }
 0x302   : > { %1150 = vrot.lane.b32.xlu0 %v1146_v4, %s3012_s29  ;;  %s2128_s29 = scalar_lea.sflag [#allocation8], %s3274_s7 }
 0x369   : > { %v1507_v8 = vpop.xlane.xlu0 %1506 }
 0x36a   : > { %v1526_v15 = vrot.slane %v1507_v8, %v3438_v10 }
 0x36b   : > { %v1510_v6 = vpop.xlane.xlu1 %1509 }
 0x36c   : > { %v1530_v12 = vrot.slane %v1510_v6, %v3438_v10 }
 0x36e   : > { %v1540_v18 = vsel %vm1539_vm4, %v1530_v12, %v1526_v15 }
 0x36f   : > { %v1149_v9 = vpop.permute.xlu1 %1148 }
 0x370   : > { %v1194_v16 = vrot.slane %v1149_v9, %v3347_v32 }
 0x371   : > { %v1513_v11 = vpop.xlane.xlu0 %1512 }
 0x372   : > { %v1534_v13 = vrot.slane %v1513_v11, %v3438_v10 }
 0x373   : > { %v1153_v14 = vpop.permute.xlu1 %1152 }
 0x374   : > { %v1202_v17 = vrot.slane %v1153_v14, %v3347_v32  ;;  %v1542_v22 = vsel %vm1541_vm5, %v1534_v13, %v1540_v18 }
 0x375   : > { %v1516_v26 = vpop.xlane.xlu0 %1515 }
 0x376   : > { %v1203_v19 = vcombine.low %v1194_v16, %v1202_v17  ;;  %v1538_v21 = vrot.slane %v1516_v26, %v3438_v10  ;;  %v1204_v25 = vcombine.high %v1194_v16, %v1202_v17 }
 0x378   : > { %v1544_v27 = vsel %vm1543_vm6, %v1538_v21, %v1542_v22  ;;  %v1211_v31 = vrot.slane %v1203_v19, %v3351_v36  ;;  %v1218_v41 = vrot.slane %v1204_v25, %v3351_v36 }
 0x379   : > { %v3458_v28 = vmax.f32 %v3446_v20, %v1544_v27  ;;  %v1151_v29 = vpop.permute.xlu0 %1150 }
 0x37a   : > { %v1168_v38 = vrot.slane %v1151_v29, %v3347_v32  ;;  %v1219_v30 = vcombine.high %v1211_v31, %v3015_v46  ;;  %v1220_v51 = vcombine.high %v1218_v41, %v3015_v46  ;;  %v1226_v52 = vshrl.u32 %v1211_v31, 16 }
 0x37b   : > { %v1547_v37 = vsub.f32 %v3446_v20, %v3458_v28  ;;  %1864 = vst.msk [vmem:[#allocation3] sm:$0xf] %vm830_vm2, %v3458_v28  ;;  %v1560_v39 = vrot.slane %v3458_v28, %v3451_v23  ;;  %v1553_v40 = vrot.slane %v3458_v28, %v3454_v24  ;;  %v1574_v49 = vrot.slane %v3458_v28, %v3463_v34 }
 0x37c   : > { %v1169_v42 = vcombine.low %v1160_v33, %v1168_v38  ;;  %v1170_v43 = vcombine.high %v1160_v33, %v1168_v38  ;;  %v1567_v50 = vrot.slane %v3458_v28, %v3466_v35  ;;  %v1234_v59 = vshrl.u32 %v1219_v30, 16 }
 0x37d   : > { %1562 = vbcast.lane.b32.xlu0 %v1560_v39, 256  ;;  %1555 = vbcast.lane.b32.xlu1 %v1553_v40, 256  ;;  %v1242_v60 = vshrl.u32 %v1218_v41, 16  ;;  %v1250_v4 = vshrl.u32 %v1220_v51, 16 }
 0x37e   : > { %v1177_v45 = vrot.slane %v1169_v42, %v3351_v36  ;;  %v1184_v47 = vrot.slane %v1170_v43, %v3351_v36 }
 0x380   : > { %v1185_v53 = vcombine.high %v1177_v45, %v3015_v46  ;;  %v1186_v54 = vcombine.high %v1184_v47, %v3015_v46  ;;  %v1223_v56 = vpack.i.b16 %v1211_v31, %v1177_v45  ;;  %v1225_v57 = vshrl.u32 %v1177_v45, 16 }
 0x381   : > { %1576 = vbcast.lane.b32.xlu0 %v1574_v49, 256  ;;  %1569 = vbcast.lane.b32.xlu1 %v1567_v50, 256  ;;  %v1239_v61 = vpack.i.b16 %v1218_v41, %v1184_v47  ;;  %v1241_v62 = vshrl.u32 %v1184_v47, 16 }
 0x382   : > { %v1227_v63 = vpack.i.b16 %v1226_v52, %v1225_v57  ;;  %v1231_v1 = vpack.i.b16 %v1219_v30, %v1185_v53  ;;  %v1233_v2 = vshrl.u32 %v1185_v53, 16  ;;  %v1247_v3 = vpack.i.b16 %v1220_v51, %v1186_v54 }
 0x383   : > { %v1243_v5 = vpack.i.b16 %v1242_v60, %v1241_v62  ;;  %v1249_v6 = vshrl.u32 %v1186_v54, 16  ;;  %v1253_v7 = vcombine.low %v1223_v56, %v1239_v61 }
 0x384   : > { %v1235_v8 = vpack.i.b16 %v1234_v59, %v1233_v2  ;;  %v1261_v9 = vcombine.low %v1231_v1, %v1247_v3 }
 0x385   : > { %v1251_v11 = vpack.i.b16 %v1250_v4, %v1249_v6  ;;  %v1278_v12 = vcombine.low %v1227_v63, %v1243_v5  ;;  %v1260_v13 = vrot.slane %v1253_v7, %v3347_v32 }
 0x386   : > { %v1268_v14 = vrot.slane %v1261_v9, %v3347_v32 }
 0x387   : > { %v1286_v15 = vcombine.low %v1235_v8, %v1251_v11  ;;  %v1285_v17 = vrot.slane %v1278_v12, %v3347_v32 }
 0x388   : > { %v1269_v16 = vcombine.low %v1260_v13, %v1268_v14 }
 0x389   : > { %v1293_v26 = vrot.slane %v1286_v15, %v3347_v32  ;;  %v1590_v15 = vld [vmem:[#allocation4] sm:$0xf] }
 0x38a   : > { %v1276_v18 = vrot.slane %v1269_v16, %v3351_v36 }
 0x38b   : > { %v1294_v19 = vcombine.low %v1285_v17, %v1293_v26 }
 0x38c   : > { %v1277_v21 = vcombine.high %v1276_v18, %v3015_v46  ;;  %v1306_v27 = vshrl.u32 %v1276_v18, 16 }
 0x38d   : > { %v1301_v22 = vrot.slane %v1294_v19, %v3351_v36 }
 0x38e   : > { %v1312_v33 = vshrl.u32 %v1277_v21, 16 }
 0x38f   : > { %v1305_v25 = vpack.i.b16 %v1301_v22, %v1276_v18  ;;  %v1307_v29 = vshrl.u32 %v1301_v22, 16  ;;  %v1302_v31 = vcombine.high %v1301_v22, %v3015_v46 }
 0x391   : > { %v1640_v38 = vsel %vm1638_vm7, %v1305_v25, 0  ;;  %v1308_v39 = vpack.i.b16 %v1307_v29, %v1306_v27  ;;  %v1311_v40 = vpack.i.b16 %v1302_v31, %v1277_v21  ;;  %v1313_v41 = vshrl.u32 %v1302_v31, 16 }
 0x392   : > { %2461 = vmatpush3.bf16.msra.mxu1 %v1640_v38 }
 0x393   : > { %v1686_v42 = vsel %vm1638_vm7, %v1308_v39, 0  ;;  %2472 = vmatprep.subr.bf16.mxu1 %v3008_v0  ;;  %v1732_v43 = vsel %vm1638_vm7, %v1311_v40, 0  ;;  %v1314_v30 = vpack.i.b16 %v1313_v41, %v1312_v33  ;;  %v1848_v39 = vld [vmem:[#allocation5] sm:$0xff]  ;;  %v1849_v41 = vld [vmem:[#allocation5 + $0x8] sm:$0xff] }
 0x394   : > { %2467 = vmatpush3.bf16.msra.mxu0 %v1686_v42 }
 0x395   : > { %2478 = vmatprep.subr.bf16.mxu0 %v3008_v0  ;;  %v1778_v45 = vsel %vm1638_vm7, %v1314_v30, 0 }
 0x3ef   : > { %v1556_v46 = vpop.permute.xlu1 %1555  ;;  %v1563_v47 = vpop.permute.xlu0 %1562 }
 0x3f0   : > { %v1578_v49 = vsub.f32 %v3416_v44, %v1556_v46  ;;  %v1579_v50 = vsub.f32 %v3420_v48, %v1563_v47  ;;  %v1548_v48 = vmul.f32 1.442695, %v1547_v37 }
 0x3f2   : > { %v1582_v51 = vmul.f32 1.442695, %v1578_v49  ;;  %v1584_v52 = vmul.f32 1.442695, %v1579_v50  ;;  %v1850_v50 = vld [vmem:[#allocation5 + $0x10] sm:$0xff] }
 0x3f3   : > { %v1570_v53 = vpop.permute.xlu1 %1569  ;;  %v1577_v54 = vpop.permute.xlu0 %1576 }
 0x3f4   : > { %2647 = vpow2.f32 %v1582_v51  ;;  %v1580_v56 = vsub.f32 %v3424_v55, %v1570_v53  ;;  %v1581_v57 = vsub.f32 %v3428_v58, %v1577_v54  ;;  %v1851_v51 = vld [vmem:[#allocation5 + $0x18] sm:$0xff] }
 0x3f5   : > { %2649 = vpow2.f32 %v1584_v52 }
 0x3f6   : > { %v1586_v59 = vmul.f32 1.442695, %v1580_v56  ;;  %v1588_v60 = vmul.f32 1.442695, %v1581_v57 }
 0x3f8   : > { %2651 = vpow2.f32 %v1586_v59 }
 0x3f9   : > { %2653 = vpow2.f32 %v1588_v60 }
 0x3fa   : > { %2655 = vpow2.f32 %v1548_v48 }
 0x401   : > { %v2648_v61 = vpop.eup %2647 }
 0x402   : > { %v2650_v62 = vpop.eup %2649  ;;  %v1592_v44 = vsel %vm837_vm3, %v2648_v61, 0.0  ;;  %v1631_v63 = vpack.c.bf16 %v2648_v61, %v2648_v61 }
 0x403   : > { %1593 = vadd.xlane.f32.xlu1 %v1592_v44  ;;  %v1595_v1 = vsel %vm837_vm3, %v2650_v62, 0.0  ;;  %v1632_v55 = vpack.c.bf16 %v2650_v62, %v2650_v62 }
 0x404   : > { %1596 = vadd.xlane.f32.xlu0 %v1595_v1  ;;  %2463 = vmatmul.mubr.msk.bf16.vlgmr.msra.gmra.mxu1 %vm837_vm3, %v1631_v63 }
 0x405   : > { %v2652_v58 = vpop.eup %2651  ;;  %2469 = vmatmul.mubr.msk.bf16.vlgmr.msra.gmra.mxu0 %vm837_vm3, %v1632_v55  ;;  %2473 = vmatpush3.bf16.msra.mxu1 %v1732_v43 }
 0x406   : > { %v2654_v2 = vpop.eup %2653  ;;  %2479 = vmatpush3.bf16.msra.mxu0 %v1778_v45  ;;  %v1598_v3 = vsel %vm837_vm3, %v2652_v58, 0.0  ;;  %2474 = vmatprep.mubr.msk.bf16.mxu1 %vm3009_vm0, %v3008_v0  ;;  %v1633_v28 = vpack.c.bf16 %v2652_v58, %v2652_v58 }
 0x407   : > { %v1601_v20 = vsel %vm837_vm3, %v2654_v2, 0.0  ;;  %2480 = vmatprep.mubr.msk.bf16.mxu0 %vm3009_vm0, %v3008_v0  ;;  %2484 = vmatprep.subr.bf16.mxu1 %v3008_v0  ;;  %v1634_v37 = vpack.c.bf16 %v2654_v2, %v2654_v2  ;;  %v2656_v4 = vpop.eup %2655 }
 0x408   : > { %1599 = vadd.xlane.f32.xlu0 %v1598_v3  ;;  %1602 = vadd.xlane.f32.xlu1 %v1601_v20  ;;  %v1830_v5 = vrot.slane %v2656_v4, %v3451_v23  ;;  %v1837_v6 = vrot.slane %v2656_v4, %v3466_v35  ;;  %v1823_v7 = vrot.slane %v2656_v4, %v3454_v24 }
 0x409   : > { %v1844_v8 = vrot.slane %v2656_v4, %v3463_v34  ;;  %v1591_v19 = vmul.f32 %v2656_v4, %v1590_v15 }
 0x40c   : > { %2475 = vmatmul.mubr.msk.bf16.vlgmr.msra.gmra.mxu1 %vm837_vm3, %v1633_v28 }
 0x40d   : > { %2481 = vmatmul.mubr.msk.bf16.vlgmr.msra.gmra.mxu0 %vm837_vm3, %v1634_v37  ;;  %2488 = vmatprep.mubr.msk.bf16.mxu1 %vm3009_vm0, %v3008_v0 }
 0x419   : > { %1832 = vbcast.lane.b32.xlu1 %v1830_v5, 256 }
 0x41d   : > { %1839 = vbcast.lane.b32.xlu1 %v1837_v6, 256 }
 0x41e   : > { %1825 = vbcast.lane.b32.xlu0 %v1823_v7, 256 }
 0x422   : > { %1846 = vbcast.lane.b32.xlu0 %v1844_v8, 256 }
 0x48c   : > { %v1594_v9 = vpop.xlane.xlu1 %1593 }
 0x48d   : > { %v1597_v11 = vpop.xlane.xlu0 %1596  ;;  %v1611_v12 = vrot.slane %v1594_v9, %v3438_v10 }
 0x48e   : > { %v1615_v13 = vrot.slane %v1597_v11, %v3438_v10 }
 0x490   : > { %v1624_v18 = vsel %vm1539_vm4, %v1615_v13, %v1611_v12 }
 0x491   : > { %v1603_v14 = vpop.xlane.xlu1 %1602  ;;  %v1600_v16 = vpop.xlane.xlu0 %1599 }
 0x492   : > { %v1623_v17 = vrot.slane %v1603_v14, %v3438_v10  ;;  %v1619_v26 = vrot.slane %v1600_v16, %v3438_v10 }
 0x494   : > { %v1625_v21 = vsel %vm1541_vm5, %v1619_v26, %v1624_v18 }
 0x495   : > { %v1626_v22 = vsel %vm1543_vm6, %v1623_v17, %v1625_v21  ;;  %v1826_v40 = vpop.permute.xlu0 %1825  ;;  %v1833_v42 = vpop.permute.xlu1 %1832 }
 0x496   : > { %v1628_v25 = vadd.f32 %v1626_v22, %v1591_v19  ;;  %v1852_v43 = vmul.f32 %v1848_v39, %v1826_v40  ;;  %v1853_v30 = vmul.f32 %v1849_v41, %v1833_v42 }
 0x498   : > { %1630 = vst.msk [vmem:[#allocation4] sm:$0xf] %vm830_vm2, %v1628_v25 }
 0x499   : > { %v1847_v52 = vpop.permute.xlu0 %1846 }
 0x49a   : > { %v1855_v59 = vmul.f32 %v1851_v51, %v1847_v52 }
 0x49f   : > { %v1868_v27 = vld [vmem:[#allocation4] sm:$0xf] }
 0x4a0   : > { %2657 = vrcp.f32 %v1868_v27 }
 0x4ad   : > { %v2658_v29 = vpop.eup %2657 }
 0x4ae   : > { %v1884_v31 = vrot.slane %v2658_v29, %v3451_v23  ;;  %v1877_v33 = vrot.slane %v2658_v29, %v3454_v24  ;;  %v1898_v10 = vrot.slane %v2658_v29, %v3463_v34  ;;  %v1891_v38 = vrot.slane %v2658_v29, %v3466_v35  ;;  %v1840_v34 = vpop.permute.xlu1 %1839  ;;  %v2645_v29 = vld [vmem:[%s3635_s9 + $0x8] sm:$0xff]  }
 0x4af   : > { %v1854_v56 = vmul.f32 %v1850_v50, %v1840_v34  ;;  %2485 = vmatpush3.bf16.msra.mxu1 %v2645_v29 }
 0x4b0   : > { %1886 = vbcast.lane.b32.xlu0 %v1884_v31, 256  ;;  %1879 = vbcast.lane.b32.xlu1 %v1877_v33, 256 }
 0x4b1   : > { %2486 = vmatprep.subr.bf16.mxu1 %v3008_v0 }
 0x4b4   : > { %1900 = vbcast.lane.b32.xlu0 %v1898_v10, 256  ;;  %1893 = vbcast.lane.b32.xlu1 %v1891_v38, 256 }
 0x4c4   : > { %v1676_v45 = vpop.f32.mrf.mxu1 }
 0x4c5   : > { %v1856_v46 = vadd.f32 %v1852_v43, %v1676_v45  ;;  %v1722_v47 = vpop.f32.mrf.mxu0  ;;  %v2646_v43 = vld [vmem:[%s3635_s9] sm:$0xff]  }
 0x4c6   : > { %v1857_v23 = vadd.f32 %v1853_v30, %v1722_v47  ;;  %v2464_v49 = vpop.f32.mrf.mxu1  ;;  %2487 = vmatpush3.bf16.msra.mxu1 %v2646_v43 }
 0x4c7   : > { %1860 = vst.msk [vmem:[#allocation5] sm:$0xff] %vm837_vm3, %v1856_v46  ;;  %v2470_v24 = vpop.f32.mrf.mxu0 }
 0x4c8   : > { %1861 = vst.msk [vmem:[#allocation5 + $0x8] sm:$0xff] %vm837_vm3, %v1857_v23  ;;  %v1679_v35 = vpop.f32.mrf.mxu1 }
 0x4c9   : > { %v1725_v53 = vpop.f32.mrf.mxu0 }
 0x4ca   : > { %v2465_v54 = vpop.f32.mrf.mxu1 }
 0x4cb   : > { %v2471_v57 = vpop.f32.mrf.mxu0 }
 0x4cc   : > { %v1768_v60 = vpop.f32.mrf.mxu1 }
 0x4cd   : > { %v1858_v61 = vadd.f32 %v1854_v56, %v1768_v60  ;;  %v1814_v62 = vpop.f32.mrf.mxu0 }
 0x4ce   : > { %v1859_v44 = vadd.f32 %v1855_v59, %v1814_v62  ;;  %v2476_v63 = vpop.f32.mrf.mxu1  ;;  %v1870_v28 = vld [vmem:[#allocation5] sm:$0xff] }
 0x4cf   : > { %1862 = vst.msk [vmem:[#allocation5 + $0x10] sm:$0xff] %vm837_vm3, %v1858_v61  ;;  %v2482_v48 = vpop.f32.mrf.mxu0  ;;  %v1871_v37 = vld [vmem:[#allocation5 + $0x8] sm:$0xff] }
 0x4d0   : > { %1863 = vst.msk [vmem:[#allocation5 + $0x18] sm:$0xff] %vm837_vm3, %v1859_v44  ;;  %v1771_v1 = vpop.f32.mrf.mxu1  ;;  %v2376_v44 = vld [vmem:[%s3688_s11] ss:$0 sm:$0xff] }
 0x4d1   : > { %v1817_v55 = vpop.f32.mrf.mxu0 }
 0x4d2   : > { %v2477_v58 = vpop.f32.mrf.mxu1 }
 0x4d3   : > { %v2483_v2 = vpop.f32.mrf.mxu0 }
 0x4d6   : > { %v1872_v4 = vld [vmem:[#allocation5 + $0x10] sm:$0xff] }
 0x4d7   : > { %v1873_v7 = vld [vmem:[#allocation5 + $0x18] sm:$0xff] }
 0x522   : > { %v1880_v3 = vpop.permute.xlu1 %1879  ;;  %v1887_v20 = vpop.permute.xlu0 %1886 }
 0x523   : > { %v1902_v8 = vmul.f32 %v1880_v3, %v1870_v28  ;;  %v1903_v9 = vmul.f32 %v1887_v20, %v1871_v37 }
 0x526   : > { %v1894_v5 = vpop.permute.xlu1 %1893  ;;  %v1901_v6 = vpop.permute.xlu0 %1900 }
 0x527   : > { %v1904_v11 = vmul.f32 %v1894_v5, %v1872_v4  ;;  %v1905_v12 = vmul.f32 %v1901_v6, %v1873_v7 }
 0x529   : > { %v1906_v13 = vcombine.low %v1902_v8, %v1904_v11  ;;  %v1907_v14 = vcombine.high %v1902_v8, %v1904_v11  ;;  %v1922_v15 = vcombine.low %v1903_v9, %v1905_v12  ;;  %v1923_v16 = vcombine.high %v1903_v9, %v1905_v12 }
 0x52b   : > { %v1914_v17 = vrot.slane %v1906_v13, %v3347_v32  ;;  %v1921_v26 = vrot.slane %v1907_v14, %v3347_v32  ;;  %v1930_v18 = vrot.slane %v1922_v15, %v3347_v32  ;;  %v1937_v19 = vrot.slane %v1923_v16, %v3347_v32 }
 0x52d   : > { %v1938_v21 = vcombine.low %v1914_v17, %v1930_v18  ;;  %v1939_v22 = vcombine.high %v1914_v17, %v1930_v18  ;;  %v1954_v25 = vcombine.low %v1921_v26, %v1937_v19  ;;  %v1955_v27 = vcombine.high %v1921_v26, %v1937_v19 }
 0x52f   : > { %v1946_v31 = vrot.slane %v1938_v21, %v3351_v36  ;;  %v1953_v33 = vrot.slane %v1939_v22, %v3351_v36  ;;  %v1962_v10 = vrot.slane %v1954_v25, %v3351_v36  ;;  %v1969_v38 = vrot.slane %v1955_v27, %v3351_v36 }
 0x531   : > { %v1974_v39 = vcombine.low %v1946_v31, %v1953_v33  ;;  %v2374_v40 = vcombine.high %v1946_v31, %v1953_v33  ;;  %v1990_v41 = vcombine.low %v1962_v10, %v1969_v38  ;;  %v2375_v42 = vcombine.high %v1962_v10, %v1969_v38 }
 0x533   : > { %v1981_v30 = vrot.slane %v1974_v39, %v3347_v32  ;;  %v1989_v45 = vrot.slane %v2374_v40, %v3347_v32  ;;  %v1997_v46 = vrot.slane %v1990_v41, %v3347_v32  ;;  %v2005_v47 = vrot.slane %v2375_v42, %v3347_v32 }
 0x535   : > { %v2007_v23 = vcombine.high %v1981_v30, %v1989_v45  ;;  %v2023_v49 = vcombine.high %v1997_v46, %v2005_v47  ;;  %v2006_v0 = vcombine.low %v1981_v30, %v1989_v45  ;;  %v2022_v24 = vcombine.low %v1997_v46, %v2005_v47 }
 0x537   : > { %v2021_v50 = vrot.slane %v2007_v23, %v3351_v36  ;;  %v2037_v34 = vrot.slane %v2023_v49, %v3351_v36  ;;  %v2014_v35 = vrot.slane %v2006_v0, %v3351_v36  ;;  %v2030_v51 = vrot.slane %v2022_v24, %v3351_v36 }
 0x539   : > { %v2040_v52 = vcombine.low %v2021_v50, %v2037_v34  ;;  %v2039_v53 = vcombine.high %v2014_v35, %v2030_v51  ;;  %v2038_v54 = vcombine.low %v2014_v35, %v2030_v51  ;;  %v2041_v32 = vcombine.high %v2021_v50, %v2037_v34 }
 0x53b   : > { %2047 = vrot.lane.b32.xlu0 %v2040_v52, %s3017_s17  ;;  %2043 = vrot.lane.b32.xlu1 %v2039_v53, %s3018_s28 }
 0x53f   : > { %2051 = vrot.lane.b32.xlu1 %v2041_v32, %s3019_s22 }
 0x5ad   : > { %v2044_v56 = vpop.permute.xlu1 %2043  ;;  %v2048_v57 = vpop.permute.xlu0 %2047 }
 0x5ae   : > { %v2054_v59 = vsel %vm837_vm3, %v2038_v54, %v2044_v56 }
 0x5af   : > { %v2056_v36 = vsel %vm2055_vm8, %v2054_v59, %v2048_v57 }
 0x5b1   : > { %v2052_v60 = vpop.permute.xlu1 %2051 }
 0x5b2   : > { %v2058_v61 = vsel %vm2057_vm9, %v2056_v36, %v2052_v60 }
 0x5b3   : > { %v2059_v62 = vpack.c.bf16 %v2058_v61, %v2058_v61 }
 0x5b5   : > { %2489 = vmatmul.mubr.msk.bf16.vlgmr.msra.gmra.mxu1 %vm613_vm1, %v2059_v62 }
 0x675   : > { %v2120_v63 = vpop.f32.mrf.mxu1 }
 0x676   : > { %v2121_v48 = vadd.f32 %v2376_v44, %v2120_v63 }
 0x677   : > { %v2490_v1 = vpop.f32.mrf.mxu1 }
 0x678   : > { %2126 = vst.msk [vmem:[%s583_s5] sm:$0xff] %vm613_vm1, %v2121_v48 }
 0x679   : > { %v2123_v55 = vpop.f32.mrf.mxu1 }
 0x67a   : > { %2912 = shalt.err (!%p2909_p11)
}
 0x67b   : > { %s2913_s25 = scalar_lea.hbm %s3577_s12, 128  ;;  %s2917_s28 = scalar_lea.hbm %s3689_s23, 256 }
 0x67c   : > { %p2914_p3 = scmp.ne.s32.totalorder %s3577_s12, %s2913_s25  ;;  %p2918_p4 = scmp.lt.s32.totalorder %s3577_s12, %s3689_s23 }
 0x67d   : > { %p2919_p8 = scmp.lt.s32.totalorder %s2917_s28, %s2913_s25 }
 0x67e   : > { %p2915_p5 = pnand %p2914_p3, %p3690_p12 }
 0x67f   : > { %p2920_p9 = por %p2919_p8, %p2918_p4 }
 0x680   : > { %p2916_p0 = pneg %p2915_p5 }
 0x682   : > { %p2921_p1 = pnand %p2920_p9, %p2916_p0 }
 0x684   : > { %2924 = shalt.err (!%p2921_p1)
}
 0x685   : > { %2522 = dma.vmem_to_hbm [thread:$0]  (%p3690_p12), %s3579_s21, 128, %s3577_s12, %s2128_s29   ;;  %v2491_v58 = vpop.f32.mrf.mxu1 }
 0x686 PF: > { %s3691_s30 = sld [smem:[#allocation28_spill]] }
 0x687   : > { %s3692_s10 = sld [smem:[#allocation33_spill]] }
 0x688   : > { %s3693_s11 = sld [smem:[#allocation30_spill]] }
 0x68c   : > { %s2154_s15 = sand.u32 1, %s3691_s30  }
 0x68d   : > { %p3694_p10 = scmp.ne.s32.totalorder %s3692_s10, 0  ;;  %s2155_s5 = scalar_lea.sflag [#allocation8], %s2154_s15 }
 0x68e   : > { %p3695_p7 = scmp.ge.s32.totalorder %s3693_s11, 2 }
 0x690   : > { %p2554_p13 = pnand %p3695_p7, %p3694_p10 }
 0x692   : > { %p2555_p6 = pneg %p2554_p13 }
 0x694   : > { %2970 = dma.done.wait (%p2555_p6), %s2155_s5, 128  }
 0x695   : > { %2972 = vsyncadd (%p2555_p6), %s2155_s5, 4294967168  ;;  %s33_s22 = sadd.s32 1, %s3693_s11   ;;  %s3696_s16 = sld [smem:[#allocation32_spill]] }
 0x696   : > { %p30_p2 = scmp.ge.s32.totalorder %s33_s22, 4   ;;  %s3697_s20 = sld [smem:[#allocation29_spill]] }
 0x697   : > { %s3698_s21 = sld [smem:[#allocation31_spill]]  ;;  %s3699_s17 = smov %s2979_s18 }
 0x698   : > { %s3700_s18 = smov %s2983_s19  ;;  %32 = sbr.rel (!%p30_p2) target bundleno = 17 (0x11), region = 165 }
 0x69b   : > { %s3701_s19 = smov %s3696_s16 }
 0x69d   :  { %2160 = vsyncpa [#allocation7], 1 }
 0x69e   :  { %2162 = vsyncpa [#allocation7 + $0x1], 1 }
 0x69f   :  { %2163 = vsyncpa [#allocation10], 1 }
 0x6a0   :  { %2165 = vsyncpa [#allocation10 + $0x1], 1 }
 0x6a1   :  { %2166 = vsyncpa [#allocation13], 1 }
 0x6a2   :  { %2167 = vsyncpa [#allocation16], 1 }
 0x6a3   :  { %2168 = vsyncpa [#allocation19], 1 }
 0x6a4   :  { %2169 = vsyncpa [#allocation8], 1 }
 0x6a5   :  { %2171 = vsyncpa [#allocation8 + $0x1], 1 }

</bundles_post_ra>
